<compile_context>
chip_gen: v7x
topology: tpu7x:2x2x1
jax: 0.10.0
libtpu: 0.0.40
codegen_flags: <defaults>
</compile_context>

<pallas_src>
import jax
import jax.numpy as jnp
from jax import lax
from jax.experimental import pallas as pl
from jax.experimental.pallas import tpu as pltpu

BN_EPS = 1e-5
IN_DIM, IN_PAD = 429, 512
OUT_DIM, OUT_PAD = 39, 128
H1, H2, H3 = 1024, 512, 128


def _round_up(n, m):
    return ((n + m - 1) // m) * m


# ----------------------------- kernel ---------------------------------------


def classifier_kernel(x_ref,
                      w1_ref, b1_ref,
                      w2_ref, b2_ref,
                      w3_ref, b3_ref,
                      w4_ref, b4_ref,
                      o_ref):
    """Fused 4-layer MLP on one (TB, IN_PAD) batch tile. BN already folded."""
    h = jnp.dot(x_ref[...], w1_ref[...], preferred_element_type=jnp.float32)
    h = jnp.maximum(h + b1_ref[...], 0.0).astype(jnp.bfloat16)

    h = jnp.dot(h, w2_ref[...], preferred_element_type=jnp.float32)
    h = jnp.maximum(h + b2_ref[...], 0.0).astype(jnp.bfloat16)

    h = jnp.dot(h, w3_ref[...], preferred_element_type=jnp.float32)
    h = jnp.maximum(h + b3_ref[...], 0.0).astype(jnp.bfloat16)

    out = jnp.dot(h, w4_ref[...], preferred_element_type=jnp.float32) + b4_ref[...]
    o_ref[...] = out  # lane-dense (TB, 128) store; cols 39..127 are zero-weight


# ----------------------------- wrapper ---------------------------------------


def classifier_forward(x, fused_params, *, tb=256):
    """x: (B, 429) float32 -> logits (B, 39) float32."""
    B = x.shape[0]
    TB = min(tb, _round_up(B, 8))
    B_pad = _round_up(B, TB)

    # Zero-pad batch to a TB multiple and features 429 -> 512; cast to bf16.
    xp = jnp.zeros((B_pad, IN_PAD), jnp.bfloat16)
    xp = xp.at[:B, :IN_DIM].set(x.astype(jnp.bfloat16))

    def resident(shape):  # weights/biases: same block every grid step (stay in VMEM)
        return pl.BlockSpec(shape, lambda i: (0, 0))

    out = pl.pallas_call(
        classifier_kernel,
        out_shape=jax.ShapeDtypeStruct((B_pad, OUT_PAD), jnp.float32),
        grid=(B_pad // TB,),
        in_specs=[
            pl.BlockSpec((TB, IN_PAD), lambda i: (i, 0)),   # x tile, pipelined
            resident((IN_PAD, H1)), resident((1, H1)),
            resident((H1, H2)),     resident((1, H2)),
            resident((H2, H3)),     resident((1, H3)),
            resident((H3, OUT_PAD)), resident((1, OUT_PAD)),
        ],
        out_specs=pl.BlockSpec((TB, OUT_PAD), lambda i: (i, 0)),
        compiler_params=pltpu.CompilerParams(
            dimension_semantics=("parallel",)),
    )(xp, *fused_params)

    return out[:B, :OUT_DIM]


# ----------------------------- parameters ------------------------------------


def init_raw_params(key):
    """Deterministic synthetic params in torch layout: W is (fan_out, fan_in)."""
    dims = [(IN_DIM, H1), (H1, H2), (H2, H3), (H3, OUT_DIM)]
    raw = []
    for i, (fan_in, fan_out) in enumerate(dims):
        key, kw, kb, kg, kbe, km, kv = jax.random.split(key, 7)
        bound = 1.0 / jnp.sqrt(fan_in)
        layer = {
            "w": jax.random.uniform(kw, (fan_out, fan_in), jnp.float32, -bound, bound),
            "b": jax.random.uniform(kb, (fan_out,), jnp.float32, -bound, bound),
        }
        if i < 3:  # BatchNorm1d for layers 1-3 only
            layer["gamma"] = 1.0 + 0.1 * jax.random.normal(kg, (fan_out,), jnp.float32)
            layer["beta"] = 0.1 * jax.random.normal(kbe, (fan_out,), jnp.float32)
            layer["mean"] = 0.1 * jax.random.normal(km, (fan_out,), jnp.float32)
            layer["var"] = jax.random.uniform(kv, (fan_out,), jnp.float32, 0.5, 1.5)
        raw.append(layer)
    return raw


def fuse_params(raw):
    """Fold eval-mode BN into each Linear, pad to lane-friendly shapes, cast
    weights to bf16 (biases stay f32)."""
    fused = []
    for i, layer in enumerate(raw):
        w = layer["w"].T.astype(jnp.float32)          # (fan_in, fan_out)
        b = layer["b"].astype(jnp.float32)
        if "gamma" in layer:
            scale = layer["gamma"] * lax.rsqrt(layer["var"] + BN_EPS)
            w = w * scale[None, :]
            b = (b - layer["mean"]) * scale + layer["beta"]
        if i == 0:    # pad contraction dim 429 -> 512 with zero rows
            w = jnp.pad(w, ((0, IN_PAD - IN_DIM), (0, 0)))
        if i == 3:    # pad output dim 39 -> 128 with zero columns
            w = jnp.pad(w, ((0, 0), (0, OUT_PAD - OUT_DIM)))
            b = jnp.pad(b, (0, OUT_PAD - OUT_DIM))
        fused.extend([w.astype(jnp.bfloat16), b.reshape(1, -1)])
    return fused


# ----------------------------- references ------------------------------------


def reference_forward_f32(x, raw):
    """Original-module eval-mode semantics in plain f32 JAX."""
    h = x
    for layer in raw:
        h = h @ layer["w"].T + layer["b"]
        if "gamma" in layer:
            h = (h - layer["mean"]) / jnp.sqrt(layer["var"] + BN_EPS) \
                * layer["gamma"] + layer["beta"]
            h = jnp.maximum(h, 0.0)   # dropout is identity in eval mode
    return h


def reference_forward_fused(x, fused):
    """Plain-JAX mirror of exactly what the kernel computes (bf16 weights)."""
    B = x.shape[0]
    xp = jnp.zeros((B, IN_PAD), jnp.bfloat16).at[:, :IN_DIM].set(x.astype(jnp.bfloat16))
    w1, b1, w2, b2, w3, b3, w4, b4 = fused
    h = jnp.maximum(jnp.dot(xp, w1, preferred_element_type=jnp.float32) + b1, 0.0).astype(jnp.bfloat16)
    h = jnp.maximum(jnp.dot(h, w2, preferred_element_type=jnp.float32) + b2, 0.0).astype(jnp.bfloat16)
    h = jnp.maximum(jnp.dot(h, w3, preferred_element_type=jnp.float32) + b3, 0.0).astype(jnp.bfloat16)
    out = jnp.dot(h, w4, preferred_element_type=jnp.float32) + b4
    return out[:, :OUT_DIM]


# ----------------------------- main -------------------------------------------


if __name__ == "__main__":
    key = jax.random.PRNGKey(0)
    key, kx = jax.random.split(key)
    B = 8
    x = jax.random.normal(kx, (B, IN_DIM), jnp.float32)

    raw = init_raw_params(key)
    fused = fuse_params(raw)

    out = classifier_forward(x, fused)
    out = jax.block_until_ready(out)
    assert out.shape == (B, OUT_DIM), out.shape

    # Tight check: kernel vs identical bf16-fused math in plain JAX.
    ref_bf16 = reference_forward_fused(x, fused)
    assert jnp.allclose(out, ref_bf16, atol=2e-3, rtol=2e-3), \
        float(jnp.max(jnp.abs(out - ref_bf16)))

    # Loose check: kernel vs original f32 module semantics (bf16 quantization).
    ref_f32 = reference_forward_f32(x, raw)
    assert jnp.allclose(out, ref_f32, atol=1e-1, rtol=5e-2), \
        float(jnp.max(jnp.abs(out - ref_f32)))

    print("KERNEL_OK")
</pallas_src>

<mosaic_0001>
module attributes {stable_mosaic.version = 11 : i64} {
  func.func @classifier_kernel(%arg0: i32, %arg1: memref<8x512xbf16, #tpu.memory_space<vmem>>, %arg2: memref<512x1024xbf16, #tpu.memory_space<vmem>>, %arg3: memref<1x1024xf32, #tpu.memory_space<vmem>>, %arg4: memref<1024x512xbf16, #tpu.memory_space<vmem>>, %arg5: memref<1x512xf32, #tpu.memory_space<vmem>>, %arg6: memref<512x128xbf16, #tpu.memory_space<vmem>>, %arg7: memref<1x128xf32, #tpu.memory_space<vmem>>, %arg8: memref<128x128xbf16, #tpu.memory_space<vmem>>, %arg9: memref<1x128xf32, #tpu.memory_space<vmem>>, %arg10: memref<8x128xf32, #tpu.memory_space<vmem>>) attributes {dimension_semantics = [#tpu.dimension_semantics<parallel>], iteration_bounds = array<i64: 1>, scalar_prefetch = 0 : i64, scratch_operands = 0 : i64, tpu.core_type = #tpu.core_type<tc>, window_params = [{transform_indices = @transform_0, window_bounds = array<i64: 8, 512>}, {pipeline_mode = #tpu.pipeline_mode<synchronous>, transform_indices = @transform_1, window_bounds = array<i64: 512, 1024>}, {pipeline_mode = #tpu.pipeline_mode<synchronous>, transform_indices = @transform_2, window_bounds = array<i64: 1, 1024>}, {pipeline_mode = #tpu.pipeline_mode<synchronous>, transform_indices = @transform_3, window_bounds = array<i64: 1024, 512>}, {pipeline_mode = #tpu.pipeline_mode<synchronous>, transform_indices = @transform_4, window_bounds = array<i64: 1, 512>}, {pipeline_mode = #tpu.pipeline_mode<synchronous>, transform_indices = @transform_5, window_bounds = array<i64: 512, 128>}, {pipeline_mode = #tpu.pipeline_mode<synchronous>, transform_indices = @transform_6, window_bounds = array<i64: 1, 128>}, {pipeline_mode = #tpu.pipeline_mode<synchronous>, transform_indices = @transform_7, window_bounds = array<i64: 128, 128>}, {pipeline_mode = #tpu.pipeline_mode<synchronous>, transform_indices = @transform_8, window_bounds = array<i64: 1, 128>}, {transform_indices = @transform_9, window_bounds = array<i64: 8, 128>}]} {
    %c0 = arith.constant 0 : index
    %c0_0 = arith.constant 0 : index
    %0 = vector.load %arg1[%c0, %c0_0] : memref<8x512xbf16, #tpu.memory_space<vmem>>, vector<8x512xbf16>
    %c0_1 = arith.constant 0 : index
    %c0_2 = arith.constant 0 : index
    %1 = vector.load %arg2[%c0_1, %c0_2] : memref<512x1024xbf16, #tpu.memory_space<vmem>>, vector<512x1024xbf16>
    %cst = arith.constant dense<0.000000e+00> : vector<8x1024xf32>
    %2 = tpu.matmul %0, %1, %cst {dimension_numbers = #tpu.dot_dimension_numbers<[1], [0], [0], [1], [0, 0, 1, 1], [], []>} : vector<8x512xbf16>, vector<512x1024xbf16>, vector<8x1024xf32> -> vector<8x1024xf32>
    %c0_3 = arith.constant 0 : index
    %c0_4 = arith.constant 0 : index
    %3 = vector.load %arg3[%c0_3, %c0_4] : memref<1x1024xf32, #tpu.memory_space<vmem>>, vector<1x1024xf32>
    %4 = vector.broadcast %3 : vector<1x1024xf32> to vector<8x1024xf32>
    %5 = arith.addf %2, %4 : vector<8x1024xf32>
    %cst_5 = arith.constant 0.000000e+00 : f32
    %6 = vector.broadcast %cst_5 : f32 to vector<8x1024xf32>
    %7 = arith.maximumf %5, %6 : vector<8x1024xf32>
    %8 = arith.truncf %7 : vector<8x1024xf32> to vector<8x1024xbf16>
    %c0_6 = arith.constant 0 : index
    %c0_7 = arith.constant 0 : index
    %9 = vector.load %arg4[%c0_6, %c0_7] : memref<1024x512xbf16, #tpu.memory_space<vmem>>, vector<1024x512xbf16>
    %cst_8 = arith.constant dense<0.000000e+00> : vector<8x512xf32>
    %10 = tpu.matmul %8, %9, %cst_8 {dimension_numbers = #tpu.dot_dimension_numbers<[1], [0], [0], [1], [0, 0, 1, 1], [], []>} : vector<8x1024xbf16>, vector<1024x512xbf16>, vector<8x512xf32> -> vector<8x512xf32>
    %c0_9 = arith.constant 0 : index
    %c0_10 = arith.constant 0 : index
    %11 = vector.load %arg5[%c0_9, %c0_10] : memref<1x512xf32, #tpu.memory_space<vmem>>, vector<1x512xf32>
    %12 = vector.broadcast %11 : vector<1x512xf32> to vector<8x512xf32>
    %13 = arith.addf %10, %12 : vector<8x512xf32>
    %cst_11 = arith.constant 0.000000e+00 : f32
    %14 = vector.broadcast %cst_11 : f32 to vector<8x512xf32>
    %15 = arith.maximumf %13, %14 : vector<8x512xf32>
    %16 = arith.truncf %15 : vector<8x512xf32> to vector<8x512xbf16>
    %c0_12 = arith.constant 0 : index
    %c0_13 = arith.constant 0 : index
    %17 = vector.load %arg6[%c0_12, %c0_13] : memref<512x128xbf16, #tpu.memory_space<vmem>>, vector<512x128xbf16>
    %cst_14 = arith.constant dense<0.000000e+00> : vector<8x128xf32>
    %18 = tpu.matmul %16, %17, %cst_14 {dimension_numbers = #tpu.dot_dimension_numbers<[1], [0], [0], [1], [0, 0, 1, 1], [], []>} : vector<8x512xbf16>, vector<512x128xbf16>, vector<8x128xf32> -> vector<8x128xf32>
    %c0_15 = arith.constant 0 : index
    %c0_16 = arith.constant 0 : index
    %19 = vector.load %arg7[%c0_15, %c0_16] : memref<1x128xf32, #tpu.memory_space<vmem>>, vector<1x128xf32>
    %20 = vector.broadcast %19 : vector<1x128xf32> to vector<8x128xf32>
    %21 = arith.addf %18, %20 : vector<8x128xf32>
    %cst_17 = arith.constant 0.000000e+00 : f32
    %22 = vector.broadcast %cst_17 : f32 to vector<8x128xf32>
    %23 = arith.maximumf %21, %22 : vector<8x128xf32>
    %24 = arith.truncf %23 : vector<8x128xf32> to vector<8x128xbf16>
    %c0_18 = arith.constant 0 : index
    %c0_19 = arith.constant 0 : index
    %25 = vector.load %arg8[%c0_18, %c0_19] : memref<128x128xbf16, #tpu.memory_space<vmem>>, vector<128x128xbf16>
    %cst_20 = arith.constant dense<0.000000e+00> : vector<8x128xf32>
    %26 = tpu.matmul %24, %25, %cst_20 {dimension_numbers = #tpu.dot_dimension_numbers<[1], [0], [0], [1], [0, 0, 1, 1], [], []>} : vector<8x128xbf16>, vector<128x128xbf16>, vector<8x128xf32> -> vector<8x128xf32>
    %c0_21 = arith.constant 0 : index
    %c0_22 = arith.constant 0 : index
    %27 = vector.load %arg9[%c0_21, %c0_22] : memref<1x128xf32, #tpu.memory_space<vmem>>, vector<1x128xf32>
    %28 = vector.broadcast %27 : vector<1x128xf32> to vector<8x128xf32>
    %29 = arith.addf %26, %28 : vector<8x128xf32>
    %c0_23 = arith.constant 0 : index
    %c0_24 = arith.constant 0 : index
    %30 = vector.load %arg10[%c0_23, %c0_24] : memref<8x128xf32, #tpu.memory_space<vmem>>, vector<8x128xf32>
    tpu.vector_store %arg10[%c0_23, %c0_24], %29 {strides = array<i32>} : memref<8x128xf32, #tpu.memory_space<vmem>>, vector<8x128xf32>,
    return
  }
  func.func @transform_0(%arg0: i32) -> (i32, i32) {
    %c0_i32 = arith.constant 0 : i32
    %c0_i32_0 = arith.constant 0 : i32
    return %arg0, %c0_i32 : i32, i32
  }
  func.func @transform_1(%arg0: i32) -> (i32, i32) {
    %c0_i32 = arith.constant 0 : i32
    %c0_i32_0 = arith.constant 0 : i32
    %c0_i32_1 = arith.constant 0 : i32
    return %c0_i32, %c0_i32_0 : i32, i32
  }
  func.func @transform_2(%arg0: i32) -> (i32, i32) {
    %c0_i32 = arith.constant 0 : i32
    %c0_i32_0 = arith.constant 0 : i32
    %c0_i32_1 = arith.constant 0 : i32
    return %c0_i32, %c0_i32_0 : i32, i32
  }
  func.func @transform_3(%arg0: i32) -> (i32, i32) {
    %c0_i32 = arith.constant 0 : i32
    %c0_i32_0 = arith.constant 0 : i32
    %c0_i32_1 = arith.constant 0 : i32
    return %c0_i32, %c0_i32_0 : i32, i32
  }
  func.func @transform_4(%arg0: i32) -> (i32, i32) {
    %c0_i32 = arith.constant 0 : i32
    %c0_i32_0 = arith.constant 0 : i32
    %c0_i32_1 = arith.constant 0 : i32
    return %c0_i32, %c0_i32_0 : i32, i32
  }
  func.func @transform_5(%arg0: i32) -> (i32, i32) {
    %c0_i32 = arith.constant 0 : i32
    %c0_i32_0 = arith.constant 0 : i32
    %c0_i32_1 = arith.constant 0 : i32
    return %c0_i32, %c0_i32_0 : i32, i32
  }
  func.func @transform_6(%arg0: i32) -> (i32, i32) {
    %c0_i32 = arith.constant 0 : i32
    %c0_i32_0 = arith.constant 0 : i32
    %c0_i32_1 = arith.constant 0 : i32
    return %c0_i32, %c0_i32_0 : i32, i32
  }
  func.func @transform_7(%arg0: i32) -> (i32, i32) {
    %c0_i32 = arith.constant 0 : i32
    %c0_i32_0 = arith.constant 0 : i32
    %c0_i32_1 = arith.constant 0 : i32
    return %c0_i32, %c0_i32_0 : i32, i32
  }
  func.func @transform_8(%arg0: i32) -> (i32, i32) {
    %c0_i32 = arith.constant 0 : i32
    %c0_i32_0 = arith.constant 0 : i32
    %c0_i32_1 = arith.constant 0 : i32
    return %c0_i32, %c0_i32_0 : i32, i32
  }
  func.func @transform_9(%arg0: i32) -> (i32, i32) {
    %c0_i32 = arith.constant 0 : i32
    %c0_i32_0 = arith.constant 0 : i32
    return %arg0, %c0_i32 : i32, i32
  }
}

</mosaic_0001>

<bundles_post_ra>
// kernel: tpu_custom_call.1
= control target key start
LH: loop header
LB: loop body
LE: loop exit
PB: predicated region body
PF: predicated region fallthrough
CT: control target
= control target key end

     0   :  { %14 = vsyncpa [#allocation3], 0  ;;  %s5945_s0 = inlined_call_operand.hbm [shape: bf16[8,512], index: 0, kind: input, shape index: {}]   ;;  %s5946_s1 = inlined_call_operand.hbm [shape: bf16[512,1024], index: 1, kind: input, shape index: {}]   ;;  %s5947_s2 = inlined_call_operand.hbm [shape: f32[1,1024], index: 2, kind: input, shape index: {}]   ;;  %s5948_s3 = inlined_call_operand.hbm [shape: bf16[1024,512], index: 3, kind: input, shape index: {}]   ;;  %s5949_s4 = inlined_call_operand.vmem [shape: f32[1,512], index: 4, kind: input, shape index: {}]   ;;  %s5950_s5 = inlined_call_operand.hbm [shape: bf16[512,128], index: 5, kind: input, shape index: {}]   ;;  %s5951_s6 = inlined_call_operand.vmem [shape: f32[1,128], index: 6, kind: input, shape index: {}]   ;;  %s5952_s7 = inlined_call_operand.hbm [shape: bf16[128,128], index: 7, kind: input, shape index: {}]   ;;  %s5953_s8 = inlined_call_operand.vmem [shape: f32[1,128], index: 8, kind: input, shape index: {}]   ;;  %s5954_s9 = inlined_call_operand.hbm [shape: f32[8,128], index: 9, kind: output, shape index: {}]  }
   0x1   :  { %15 = vsyncpa [#allocation6], 0 }
   0x2   :  { %16 = vsyncpa [#allocation9], 0 }
   0x3   :  { %17 = vsyncpa [#allocation12], 0 }
   0x4   :  { %18 = vsyncpa [#allocation4], 0  ;;  %s5709_s30 = smov [#allocation5]   ;;  %s5545_s13 = scalar_lea.hbm %s5946_s1, 32768 }
   0x5   :  { %s34_s10 = sshll.u32 %s5709_s30, 4  ;;  %p5546_p0 = scmp.ne.s32.totalorder %s5946_s1, %s5545_s13  ;;  %s35_s10 = int_to_ptr.vmem [resolvable:$true] %s34_s10 }
   0x6   :  { %p5549_p1 = scmp.lt.u32.totalorder %s5545_s13, %s5946_s1 }
   0x8   :  { %p5551_p2 = pnand %p5549_p1, %p5546_p0 }
   0xa   :  { %5554 = shalt.err (!%p5551_p2)
}
   0xb   :  { %s5555_s18 = scalar_lea.vmem %s35_s10, 32768  ;;  %p5560_p4 = scmp.lt.s32.totalorder %s35_s10, %s35_s10 }
   0xc   :  { %p5556_p3 = scmp.ne.s32.totalorder %s35_s10, %s5555_s18  ;;  %p5561_p5 = scmp.lt.s32.totalorder %s5555_s18, %s5555_s18 }
   0xe   :  { %p5562_p6 = por %p5561_p5, %p5560_p4 }
  0x10   :  { %p5563_p7 = pnand %p5562_p6, %p5556_p3 }
  0x12   :  { %5566 = shalt.err (!%p5563_p7)
}
  0x13   :  { %s5710_s19 = smov 512   ;;  %s5711_s20 = smov 32  }
  0x14   :  { %40 = dma.hbm_to_vmem [thread:$0]  %s5946_s1, 32768, %s35_s10, [#allocation6], %s5710_s19, %s5710_s19, %s5711_s20  }
  0x15   :  { %s5712_s23 = smov [#allocation8]   ;;  %s5567_s27 = scalar_lea.hbm %s5948_s3, 32768 }
  0x16   :  { %s56_s24 = sshll.u32 %s5712_s23, 4  ;;  %p5568_p8 = scmp.ne.s32.totalorder %s5948_s3, %s5567_s27  ;;  %s57_s24 = int_to_ptr.vmem [resolvable:$true] %s56_s24 }
  0x17   :  { %p5571_p9 = scmp.lt.u32.totalorder %s5567_s27, %s5948_s3 }
  0x19   :  { %p5573_p10 = pnand %p5571_p9, %p5568_p8 }
  0x1b   :  { %5576 = shalt.err (!%p5573_p10)
}
  0x1c   :  { %s5577_s12 = scalar_lea.vmem %s57_s24, 32768  ;;  %p5582_p12 = scmp.lt.s32.totalorder %s57_s24, %s57_s24 }
  0x1d   :  { %p5578_p11 = scmp.ne.s32.totalorder %s57_s24, %s5577_s12  ;;  %p5583_p13 = scmp.lt.s32.totalorder %s5577_s12, %s5577_s12 }
  0x1f   :  { %p5584_p0 = por %p5583_p13, %p5582_p12 }
  0x21   :  { %p5585_p1 = pnand %p5584_p0, %p5578_p11 }
  0x23   :  { %5588 = shalt.err (!%p5585_p1)
}
  0x24   :  { %s5713_s1 = smov 256   ;;  %s5714_s10 = smov 16  }
  0x25   :  { %62 = dma.hbm_to_vmem [thread:$0]  %s5948_s3, 32768, %s57_s24, [#allocation9], %s5713_s1, %s5713_s1, %s5714_s10  }
  0x26   :  { %s5715_s15 = smov [#allocation2]   ;;  %s5716_s17 = smov [#allocation7]  }
  0x27   :  { %s25_s16 = sshll.u32 %s5715_s15, 4  ;;  %s47_s18 = sshll.u32 %s5716_s17, 4  ;;  %s26_s16 = int_to_ptr.vmem [resolvable:$true] %s25_s16  ;;  %s48_s18 = int_to_ptr.vmem [resolvable:$true] %s47_s18 }
  0x28   :  { %s5589_s21 = scalar_lea.hbm %s5945_s0, 256 }
  0x29   :  { %p5590_p2 = scmp.ne.s32.totalorder %s5945_s0, %s5589_s21  ;;  %p5593_p3 = scmp.lt.u32.totalorder %s5589_s21, %s5945_s0 }
  0x2b   :  { %p5595_p4 = pnand %p5593_p3, %p5590_p2 }
  0x2d   :  { %5598 = shalt.err (!%p5595_p4)
}
  0x2e   :  { %s5599_s3 = scalar_lea.vmem %s26_s16, 256  ;;  %p5604_p6 = scmp.lt.s32.totalorder %s26_s16, %s26_s16 }
  0x2f   :  { %p5600_p5 = scmp.ne.s32.totalorder %s26_s16, %s5599_s3  ;;  %p5605_p7 = scmp.lt.s32.totalorder %s5599_s3, %s5599_s3 }
  0x31   :  { %p5606_p8 = por %p5605_p7, %p5604_p6 }
  0x33   :  { %p5607_p9 = pnand %p5606_p8, %p5600_p5 }
  0x35   :  { %5610 = shalt.err (!%p5607_p9)
}
  0x36   :  { %28 = dma.hbm_to_vmem [thread:$0]  %s5945_s0, 256, %s26_s16, [#allocation3]  }
  0x37   :  { %s5611_s30 = scalar_lea.hbm %s5947_s2, 128 }
  0x38   :  { %p5612_p10 = scmp.ne.s32.totalorder %s5947_s2, %s5611_s30  ;;  %p5615_p11 = scmp.lt.u32.totalorder %s5611_s30, %s5947_s2 }
  0x3a   :  { %p5617_p12 = pnand %p5615_p11, %p5612_p10 }
  0x3c   :  { %5620 = shalt.err (!%p5617_p12)
}
  0x3d   :  { %s5621_s13 = scalar_lea.vmem %s48_s18, 128  ;;  %p5626_p0 = scmp.lt.s32.totalorder %s48_s18, %s48_s18 }
  0x3e   :  { %p5622_p13 = scmp.ne.s32.totalorder %s48_s18, %s5621_s13  ;;  %p5627_p1 = scmp.lt.s32.totalorder %s5621_s13, %s5621_s13 }
  0x40   :  { %p5628_p2 = por %p5627_p1, %p5626_p0 }
  0x42   :  { %p5629_p3 = pnand %p5628_p2, %p5622_p13 }
  0x44   :  { %5632 = shalt.err (!%p5629_p3)
}
  0x45   :  { %50 = dma.hbm_to_vmem [thread:$0]  %s5947_s2, 128, %s48_s18, [#allocation6]  }
  0x46   :  { %s5717_s15 = smov [#allocation10]   ;;  %s5633_s20 = scalar_lea.hbm %s5950_s5, 4096 }
  0x47   :  { %s70_s16 = sshll.u32 %s5717_s15, 4  ;;  %p5634_p4 = scmp.ne.s32.totalorder %s5950_s5, %s5633_s20  ;;  %s71_s16 = int_to_ptr.vmem [resolvable:$true] %s70_s16 }
  0x48   :  { %p5637_p5 = scmp.lt.u32.totalorder %s5633_s20, %s5950_s5 }
  0x4a   :  { %p5639_p6 = pnand %p5637_p5, %p5634_p4 }
  0x4c   :  { %5642 = shalt.err (!%p5639_p6)
}
  0x4d   :  { %s5643_s26 = scalar_lea.vmem %s71_s16, 4096  ;;  %p5648_p8 = scmp.lt.s32.totalorder %s71_s16, %s71_s16 }
  0x4e   :  { %p5644_p7 = scmp.ne.s32.totalorder %s71_s16, %s5643_s26  ;;  %p5649_p9 = scmp.lt.s32.totalorder %s5643_s26, %s5643_s26 }
  0x50   :  { %p5650_p10 = por %p5649_p9, %p5648_p8 }
  0x52   :  { %p5651_p11 = pnand %p5650_p10, %p5644_p7 }
  0x54   :  { %5654 = shalt.err (!%p5651_p11)
}
  0x55   :  { %s5718_s2 = smov 64   ;;  %s5719_s18 = smov 4  }
  0x56   :  { %76 = dma.hbm_to_vmem [thread:$0]  %s5950_s5, 4096, %s71_s16, [#allocation9], %s5718_s2, %s5718_s2, %s5719_s18  }
  0x57   :  { %s5720_s27 = smov [#allocation11]   ;;  %s5655_s11 = scalar_lea.hbm %s5952_s7, 1024 }
  0x58   :  { %s84_s28 = sshll.u32 %s5720_s27, 4  ;;  %p5656_p12 = scmp.ne.s32.totalorder %s5952_s7, %s5655_s11  ;;  %s85_s28 = int_to_ptr.vmem [resolvable:$true] %s84_s28 }
  0x59   :  { %p5659_p13 = scmp.lt.u32.totalorder %s5655_s11, %s5952_s7 }
  0x5b   :  { %p5661_p0 = pnand %p5659_p13, %p5656_p12 }
  0x5d   :  { %5664 = shalt.err (!%p5661_p0)
}
  0x5e   :  { %s5665_s0 = scalar_lea.vmem %s85_s28, 1024  ;;  %p5670_p2 = scmp.lt.s32.totalorder %s85_s28, %s85_s28 }
  0x5f   :  { %p5666_p1 = scmp.ne.s32.totalorder %s85_s28, %s5665_s0  ;;  %p5671_p3 = scmp.lt.s32.totalorder %s5665_s0, %s5665_s0 }
  0x61   :  { %p5672_p4 = por %p5671_p3, %p5670_p2 }
  0x63   :  { %p5673_p5 = pnand %p5672_p4, %p5666_p1 }
  0x65   :  { %5676 = shalt.err (!%p5673_p5)
}
  0x66   :  { %90 = dma.hbm_to_vmem [thread:$0]  %s5952_s7, 1024, %s85_s28, [#allocation12], %s5718_s2, %s5718_s2, %s5719_s18  }
  0x67   :  { %5699 = dma.done.wait [#allocation3], 256  }
  0x68   :  { %5700 = vsyncadd [#allocation3], 4294967040 }
  0x69   :  { %5701 = dma.done.wait [#allocation6], 32896  }
  0x6a   :  { %5702 = vsyncadd [#allocation6], 4294934400 }
  0x6b   :  { %5703 = dma.done.wait [#allocation9], 36864  }
  0x6c   :  { %5704 = vsyncadd [#allocation9], 4294930432 }
  0x6d   :  { %5705 = dma.done.wait [#allocation12], 1024  }
  0x6e   :  { %5706 = vsyncadd [#allocation12], 4294966272  ;;  %v114_v0 = vld [vmem:[#allocation5] sm:$0xff]  ;;  %v115_v2 = vld [vmem:[#allocation5 + $0x8] sm:$0xff]  ;;  %vm5722_vm0 = vmmov 0   ;;  %s5723_s20 = smov [#allocation13]  }
  0x6f   :  { %v118_v1 = vld [vmem:[#allocation5 + $0x20] sm:$0xff]  ;;  %v119_v4 = vld [vmem:[#allocation5 + $0x28] sm:$0xff]  ;;  %v5846_v53 = vld [vmem:[#allocation2] sm:$0xff]  ;;  %s4407_s21 = sshll.u32 %s5723_s20, 4  ;;  %s4408_s21 = int_to_ptr.vmem [resolvable:$true] %s4407_s21 }
  0x70   :  { %v4424_v3 = vcombine.high %v114_v0, %v118_v1  ;;  %v4423_v5 = vcombine.low %v114_v0, %v118_v1  ;;  %v122_v6 = vld [vmem:[#allocation5 + $0x40] sm:$0xff]  ;;  %v4426_v8 = vcombine.high %v115_v2, %v119_v4  ;;  %v4425_v9 = vcombine.low %v115_v2, %v119_v4  ;;  %v123_v11 = vld [vmem:[#allocation5 + $0x48] sm:$0xff]  ;;  %p5682_p7 = scmp.lt.s32.totalorder %s4408_s21, %s4408_s21 }
  0x71   :  { %v126_v7 = vld [vmem:[#allocation5 + $0x60] sm:$0xff]  ;;  %v127_v12 = vld [vmem:[#allocation5 + $0x68] sm:$0xff]  ;;  %v5850_v57 = vcombine.high %v5846_v53, %v5846_v53 }
  0x72   :  { %v4432_v10 = vcombine.high %v122_v6, %v126_v7  ;;  %v130_v13 = vld [vmem:[#allocation5 + $0x80] sm:$0xff]  ;;  %1706 = vmatprep.subr.bf16.mxu0 %v4424_v3  ;;  %v4434_v14 = vcombine.high %v123_v11, %v127_v12  ;;  %v131_v16 = vld [vmem:[#allocation5 + $0x88] sm:$0xff]  ;;  %1788 = vmatprep.subr.bf16.mxu1 %v4426_v8  ;;  %v4431_v18 = vcombine.low %v122_v6, %v126_v7 }
  0x73   :  { %v134_v15 = vld [vmem:[#allocation5 + $0xa0] sm:$0xff]  ;;  %v135_v17 = vld [vmem:[#allocation5 + $0xa8] sm:$0xff]  ;;  %1707 = vmatpush1.bf16.msra.mxu0 %v4423_v5  ;;  %1789 = vmatpush1.bf16.msra.mxu1 %v4425_v9  ;;  %v4433_v19 = vcombine.low %v123_v11, %v127_v12 }
  0x74   :  { %1708 = vmatprep.subr.bf16.mxu0 %v4432_v10  ;;  %v4440_v20 = vcombine.high %v130_v13, %v134_v15  ;;  %1790 = vmatprep.subr.bf16.mxu1 %v4434_v14  ;;  %v4442_v21 = vcombine.high %v131_v16, %v135_v17  ;;  %v138_v22 = vld [vmem:[#allocation5 + $0xc0] sm:$0xff]  ;;  %v139_v24 = vld [vmem:[#allocation5 + $0xc8] sm:$0xff]  ;;  %v4439_v26 = vcombine.low %v130_v13, %v134_v15 }
  0x75   :  { %v142_v23 = vld [vmem:[#allocation5 + $0xe0] sm:$0xff]  ;;  %v143_v25 = vld [vmem:[#allocation5 + $0xe8] sm:$0xff]  ;;  %v4441_v27 = vcombine.low %v131_v16, %v135_v17  ;;  %1738 = vmatprep.mubr.bf16.mxu0 %v5850_v57  ;;  %1820 = vmatprep.mubr.bf16.mxu1 %v5850_v57 }
  0x76   :  { %v4448_v28 = vcombine.high %v138_v22, %v142_v23  ;;  %v4450_v29 = vcombine.high %v139_v24, %v143_v25  ;;  %v146_v30 = vld [vmem:[#allocation5 + $0x100] sm:$0xff]  ;;  %v147_v32 = vld [vmem:[#allocation5 + $0x108] sm:$0xff]  ;;  %v4447_v34 = vcombine.low %v138_v22, %v142_v23  ;;  %v4449_v35 = vcombine.low %v139_v24, %v143_v25 }
  0x77   :  { %1709 = vmatpush1.bf16.msra.mxu0 %v4431_v18  ;;  %1791 = vmatpush1.bf16.msra.mxu1 %v4433_v19  ;;  %v150_v31 = vld [vmem:[#allocation5 + $0x120] sm:$0xff]  ;;  %v151_v33 = vld [vmem:[#allocation5 + $0x128] sm:$0xff] }
  0x78   :  { %1710 = vmatprep.subr.bf16.mxu0 %v4440_v20  ;;  %1792 = vmatprep.subr.bf16.mxu1 %v4442_v21  ;;  %v4456_v36 = vcombine.high %v146_v30, %v150_v31  ;;  %v4458_v37 = vcombine.high %v147_v32, %v151_v33  ;;  %v154_v38 = vld [vmem:[#allocation5 + $0x140] sm:$0xff]  ;;  %v155_v40 = vld [vmem:[#allocation5 + $0x148] sm:$0xff]  ;;  %v4455_v42 = vcombine.low %v146_v30, %v150_v31 }
  0x79   :  { %v158_v39 = vld [vmem:[#allocation5 + $0x160] sm:$0xff]  ;;  %v159_v41 = vld [vmem:[#allocation5 + $0x168] sm:$0xff]  ;;  %v4457_v43 = vcombine.low %v147_v32, %v151_v33 }
  0x7a   :  { %v4464_v44 = vcombine.high %v154_v38, %v158_v39  ;;  %v4466_v45 = vcombine.high %v155_v40, %v159_v41  ;;  %v162_v46 = vld [vmem:[#allocation5 + $0x180] sm:$0xff]  ;;  %v163_v48 = vld [vmem:[#allocation5 + $0x188] sm:$0xff]  ;;  %v4463_v50 = vcombine.low %v154_v38, %v158_v39  ;;  %v4465_v51 = vcombine.low %v155_v40, %v159_v41 }
  0x7b   :  { %1711 = vmatpush1.bf16.msra.mxu0 %v4439_v26  ;;  %1793 = vmatpush1.bf16.msra.mxu1 %v4441_v27  ;;  %v166_v47 = vld [vmem:[#allocation5 + $0x1a0] sm:$0xff]  ;;  %v167_v49 = vld [vmem:[#allocation5 + $0x1a8] sm:$0xff] }
  0x7c   :  { %1712 = vmatprep.subr.bf16.mxu0 %v4448_v28  ;;  %1794 = vmatprep.subr.bf16.mxu1 %v4450_v29  ;;  %v4472_v52 = vcombine.high %v162_v46, %v166_v47  ;;  %v4474_v54 = vcombine.high %v163_v48, %v167_v49  ;;  %v170_v55 = vld [vmem:[#allocation5 + $0x1c0] sm:$0xff]  ;;  %v171_v58 = vld [vmem:[#allocation5 + $0x1c8] sm:$0xff]  ;;  %v4471_v60 = vcombine.low %v162_v46, %v166_v47 }
  0x7d   :  { %v174_v56 = vld [vmem:[#allocation5 + $0x1e0] sm:$0xff]  ;;  %v175_v59 = vld [vmem:[#allocation5 + $0x1e8] sm:$0xff]  ;;  %v4473_v61 = vcombine.low %v163_v48, %v167_v49 }
  0x7e   :  { %v4480_v62 = vcombine.high %v170_v55, %v174_v56  ;;  %v4482_v63 = vcombine.high %v171_v58, %v175_v59  ;;  %v178_v0 = vld [vmem:[#allocation5 + $0x200] sm:$0xff]  ;;  %v179_v2 = vld [vmem:[#allocation5 + $0x208] sm:$0xff]  ;;  %v4479_v4 = vcombine.low %v170_v55, %v174_v56  ;;  %v4481_v5 = vcombine.low %v171_v58, %v175_v59 }
  0x7f   :  { %1713 = vmatpush1.bf16.msra.mxu0 %v4447_v34  ;;  %1795 = vmatpush1.bf16.msra.mxu1 %v4449_v35  ;;  %v182_v1 = vld [vmem:[#allocation5 + $0x220] sm:$0xff]  ;;  %v183_v3 = vld [vmem:[#allocation5 + $0x228] sm:$0xff] }
  0x80   :  { %1714 = vmatprep.subr.bf16.mxu0 %v4456_v36  ;;  %1796 = vmatprep.subr.bf16.mxu1 %v4458_v37  ;;  %v4488_v6 = vcombine.high %v178_v0, %v182_v1  ;;  %v4490_v7 = vcombine.high %v179_v2, %v183_v3  ;;  %v186_v8 = vld [vmem:[#allocation5 + $0x240] sm:$0xff]  ;;  %v187_v10 = vld [vmem:[#allocation5 + $0x248] sm:$0xff]  ;;  %v4487_v12 = vcombine.low %v178_v0, %v182_v1 }
  0x81   :  { %v190_v9 = vld [vmem:[#allocation5 + $0x260] sm:$0xff]  ;;  %v191_v11 = vld [vmem:[#allocation5 + $0x268] sm:$0xff]  ;;  %v4489_v13 = vcombine.low %v179_v2, %v183_v3 }
  0x82   :  { %v4496_v14 = vcombine.high %v186_v8, %v190_v9  ;;  %v4498_v15 = vcombine.high %v187_v10, %v191_v11  ;;  %v194_v16 = vld [vmem:[#allocation5 + $0x280] sm:$0xff]  ;;  %v195_v18 = vld [vmem:[#allocation5 + $0x288] sm:$0xff]  ;;  %v4495_v20 = vcombine.low %v186_v8, %v190_v9  ;;  %v4497_v21 = vcombine.low %v187_v10, %v191_v11 }
  0x83   :  { %1715 = vmatpush1.bf16.msra.mxu0 %v4455_v42  ;;  %1797 = vmatpush1.bf16.msra.mxu1 %v4457_v43  ;;  %v198_v17 = vld [vmem:[#allocation5 + $0x2a0] sm:$0xff]  ;;  %v199_v19 = vld [vmem:[#allocation5 + $0x2a8] sm:$0xff] }
  0x84   :  { %1716 = vmatprep.subr.bf16.mxu0 %v4464_v44  ;;  %1798 = vmatprep.subr.bf16.mxu1 %v4466_v45  ;;  %v4504_v22 = vcombine.high %v194_v16, %v198_v17  ;;  %v4506_v23 = vcombine.high %v195_v18, %v199_v19  ;;  %v202_v24 = vld [vmem:[#allocation5 + $0x2c0] sm:$0xff]  ;;  %v203_v26 = vld [vmem:[#allocation5 + $0x2c8] sm:$0xff]  ;;  %v4503_v28 = vcombine.low %v194_v16, %v198_v17 }
  0x85   :  { %v206_v25 = vld [vmem:[#allocation5 + $0x2e0] sm:$0xff]  ;;  %v207_v27 = vld [vmem:[#allocation5 + $0x2e8] sm:$0xff]  ;;  %v4505_v29 = vcombine.low %v195_v18, %v199_v19 }
  0x86   :  { %v4512_v30 = vcombine.high %v202_v24, %v206_v25  ;;  %v4514_v31 = vcombine.high %v203_v26, %v207_v27  ;;  %v210_v32 = vld [vmem:[#allocation5 + $0x300] sm:$0xff]  ;;  %v211_v34 = vld [vmem:[#allocation5 + $0x308] sm:$0xff]  ;;  %v4511_v36 = vcombine.low %v202_v24, %v206_v25  ;;  %v4513_v37 = vcombine.low %v203_v26, %v207_v27 }
  0x87   :  { %1717 = vmatpush1.bf16.msra.mxu0 %v4463_v50  ;;  %1799 = vmatpush1.bf16.msra.mxu1 %v4465_v51  ;;  %v214_v33 = vld [vmem:[#allocation5 + $0x320] sm:$0xff]  ;;  %v215_v35 = vld [vmem:[#allocation5 + $0x328] sm:$0xff] }
  0x88   :  { %1718 = vmatprep.subr.bf16.mxu0 %v4472_v52  ;;  %1800 = vmatprep.subr.bf16.mxu1 %v4474_v54  ;;  %v4520_v38 = vcombine.high %v210_v32, %v214_v33  ;;  %v4522_v39 = vcombine.high %v211_v34, %v215_v35  ;;  %v218_v40 = vld [vmem:[#allocation5 + $0x340] sm:$0xff]  ;;  %v219_v42 = vld [vmem:[#allocation5 + $0x348] sm:$0xff]  ;;  %v4519_v44 = vcombine.low %v210_v32, %v214_v33 }
  0x89   :  { %v222_v41 = vld [vmem:[#allocation5 + $0x360] sm:$0xff]  ;;  %v223_v43 = vld [vmem:[#allocation5 + $0x368] sm:$0xff]  ;;  %v4521_v45 = vcombine.low %v211_v34, %v215_v35 }
  0x8a   :  { %v4528_v46 = vcombine.high %v218_v40, %v222_v41  ;;  %v4530_v47 = vcombine.high %v219_v42, %v223_v43  ;;  %v226_v48 = vld [vmem:[#allocation5 + $0x380] sm:$0xff]  ;;  %v227_v50 = vld [vmem:[#allocation5 + $0x388] sm:$0xff]  ;;  %v4527_v52 = vcombine.low %v218_v40, %v222_v41  ;;  %v4529_v54 = vcombine.low %v219_v42, %v223_v43 }
  0x8b   :  { %1719 = vmatpush1.bf16.msra.mxu0 %v4471_v60  ;;  %1801 = vmatpush1.bf16.msra.mxu1 %v4473_v61  ;;  %v230_v49 = vld [vmem:[#allocation5 + $0x3a0] sm:$0xff]  ;;  %v231_v51 = vld [vmem:[#allocation5 + $0x3a8] sm:$0xff] }
  0x8c   :  { %1720 = vmatprep.subr.bf16.mxu0 %v4480_v62  ;;  %1802 = vmatprep.subr.bf16.mxu1 %v4482_v63  ;;  %v4536_v55 = vcombine.high %v226_v48, %v230_v49  ;;  %v4538_v56 = vcombine.high %v227_v50, %v231_v51  ;;  %v234_v58 = vld [vmem:[#allocation5 + $0x3c0] sm:$0xff]  ;;  %v235_v60 = vld [vmem:[#allocation5 + $0x3c8] sm:$0xff]  ;;  %v4535_v62 = vcombine.low %v226_v48, %v230_v49 }
  0x8d   :  { %v238_v59 = vld [vmem:[#allocation5 + $0x3e0] sm:$0xff]  ;;  %v239_v61 = vld [vmem:[#allocation5 + $0x3e8] sm:$0xff]  ;;  %v4537_v63 = vcombine.low %v227_v50, %v231_v51 }
  0x8e   :  { %v4544_v0 = vcombine.high %v234_v58, %v238_v59  ;;  %v4546_v1 = vcombine.high %v235_v60, %v239_v61  ;;  %v242_v2 = vld [vmem:[#allocation5 + $0x400] sm:$0xff] }
  0x8f   :  { %1721 = vmatpush1.bf16.msra.mxu0 %v4479_v4  ;;  %1803 = vmatpush1.bf16.msra.mxu1 %v4481_v5  ;;  %v246_v3 = vld [vmem:[#allocation5 + $0x420] sm:$0xff]  ;;  %v243_v4 = vld [vmem:[#allocation5 + $0x408] sm:$0xff] }
  0x90   :  { %1722 = vmatprep.subr.bf16.mxu0 %v4488_v6  ;;  %1804 = vmatprep.subr.bf16.mxu1 %v4490_v7  ;;  %v247_v5 = vld [vmem:[#allocation5 + $0x428] sm:$0xff]  ;;  %v4543_v6 = vcombine.low %v234_v58, %v238_v59  ;;  %v4545_v7 = vcombine.low %v235_v60, %v239_v61  ;;  %v4552_v8 = vcombine.high %v242_v2, %v246_v3  ;;  %v250_v10 = vld [vmem:[#allocation5 + $0x440] sm:$0xff] }
  0x91   :  { %v4554_v9 = vcombine.high %v243_v4, %v247_v5  ;;  %v254_v11 = vld [vmem:[#allocation5 + $0x460] sm:$0xff]  ;;  %v4551_v16 = vcombine.low %v242_v2, %v246_v3  ;;  %v4553_v17 = vcombine.low %v243_v4, %v247_v5 }
  0x92   :  { %v4560_v18 = vcombine.high %v250_v10, %v254_v11  ;;  %v258_v19 = vld [vmem:[#allocation5 + $0x480] sm:$0xff]  ;;  %v4559_v24 = vcombine.low %v250_v10, %v254_v11 }
  0x93   :  { %1723 = vmatpush1.bf16.msra.mxu0 %v4487_v12  ;;  %1805 = vmatpush1.bf16.msra.mxu1 %v4489_v13  ;;  %v5856_v12 = vcombine.low %v5846_v53, %v5846_v53  ;;  %v251_v13 = vld [vmem:[#allocation5 + $0x448] sm:$0xff]  ;;  %v266_v27 = vld [vmem:[#allocation5 + $0x4c0] sm:$0xff] }
  0x94   :  { %1724 = vmatprep.subr.bf16.mxu0 %v4496_v14  ;;  %1806 = vmatprep.subr.bf16.mxu1 %v4498_v15  ;;  %v255_v14 = vld [vmem:[#allocation5 + $0x468] sm:$0xff]  ;;  %v5858_v15 = vld [vmem:[#allocation2 + $0x8] sm:$0xff]  ;;  %v274_v35 = vld [vmem:[#allocation5 + $0x500] sm:$0xff] }
  0x95   :  { %v5862_v53 = vcombine.high %v5858_v15, %v5858_v15  ;;  %v4561_v25 = vcombine.low %v251_v13, %v255_v14  ;;  %v282_v43 = vld [vmem:[#allocation5 + $0x540] sm:$0xff] }
  0x96   :  { %v290_v51 = vld [vmem:[#allocation5 + $0x580] sm:$0xff] }
  0x97   :  { %1725 = vmatpush1.bf16.msra.mxu0 %v4495_v20  ;;  %1807 = vmatpush1.bf16.msra.mxu1 %v4497_v21  ;;  %v262_v20 = vld [vmem:[#allocation5 + $0x4a0] sm:$0xff]  ;;  %v259_v21 = vld [vmem:[#allocation5 + $0x488] sm:$0xff] }
  0x98   :  { %1726 = vmatprep.subr.bf16.mxu0 %v4504_v22  ;;  %1808 = vmatprep.subr.bf16.mxu1 %v4506_v23  ;;  %v4562_v22 = vcombine.high %v251_v13, %v255_v14  ;;  %v263_v23 = vld [vmem:[#allocation5 + $0x4a8] sm:$0xff]  ;;  %v4568_v26 = vcombine.high %v258_v19, %v262_v20  ;;  %v4567_v32 = vcombine.low %v258_v19, %v262_v20  ;;  %v298_v61 = vld [vmem:[#allocation5 + $0x5c0] sm:$0xff] }
  0x99   :  { %v4569_v33 = vcombine.low %v259_v21, %v263_v23  ;;  %v306_v5 = vld [vmem:[#allocation5 + $0x600] sm:$0xff]  ;;  %v319_v19 = vld [vmem:[#allocation5 + $0x668] sm:$0xff] }
  0x9a   :  { %v314_v14 = vld [vmem:[#allocation5 + $0x640] sm:$0xff] }
  0x9b   :  { %1727 = vmatpush1.bf16.msra.mxu0 %v4503_v28  ;;  %1809 = vmatpush1.bf16.msra.mxu1 %v4505_v29  ;;  %v270_v28 = vld [vmem:[#allocation5 + $0x4e0] sm:$0xff]  ;;  %v267_v29 = vld [vmem:[#allocation5 + $0x4c8] sm:$0xff] }
  0x9c   :  { %1728 = vmatprep.subr.bf16.mxu0 %v4512_v30  ;;  %1810 = vmatprep.subr.bf16.mxu1 %v4514_v31  ;;  %v4570_v30 = vcombine.high %v259_v21, %v263_v23  ;;  %v271_v31 = vld [vmem:[#allocation5 + $0x4e8] sm:$0xff]  ;;  %v4576_v34 = vcombine.high %v266_v27, %v270_v28  ;;  %v4575_v40 = vcombine.low %v266_v27, %v270_v28  ;;  %v322_v23 = vld [vmem:[#allocation5 + $0x680] sm:$0xff] }
  0x9d   :  { %v4577_v41 = vcombine.low %v267_v29, %v271_v31  ;;  %v327_v27 = vld [vmem:[#allocation5 + $0x6a8] sm:$0xff] }
  0x9f   :  { %1729 = vmatpush1.bf16.msra.mxu0 %v4511_v36  ;;  %1811 = vmatpush1.bf16.msra.mxu1 %v4513_v37  ;;  %v278_v36 = vld [vmem:[#allocation5 + $0x520] sm:$0xff]  ;;  %v275_v37 = vld [vmem:[#allocation5 + $0x508] sm:$0xff] }
  0xa0   :  { %1730 = vmatprep.subr.bf16.mxu0 %v4520_v38  ;;  %1812 = vmatprep.subr.bf16.mxu1 %v4522_v39  ;;  %v4578_v38 = vcombine.high %v267_v29, %v271_v31  ;;  %v279_v39 = vld [vmem:[#allocation5 + $0x528] sm:$0xff]  ;;  %v4584_v42 = vcombine.high %v274_v35, %v278_v36  ;;  %v4583_v48 = vcombine.low %v274_v35, %v278_v36  ;;  %v330_v31 = vld [vmem:[#allocation5 + $0x6c0] sm:$0xff] }
  0xa1   :  { %v4585_v49 = vcombine.low %v275_v37, %v279_v39  ;;  %v335_v35 = vld [vmem:[#allocation5 + $0x6e8] sm:$0xff] }
  0xa3   :  { %1731 = vmatpush1.bf16.msra.mxu0 %v4519_v44  ;;  %1813 = vmatpush1.bf16.msra.mxu1 %v4521_v45  ;;  %v286_v44 = vld [vmem:[#allocation5 + $0x560] sm:$0xff]  ;;  %v283_v45 = vld [vmem:[#allocation5 + $0x548] sm:$0xff] }
  0xa4   :  { %1732 = vmatprep.subr.bf16.mxu0 %v4528_v46  ;;  %1814 = vmatprep.subr.bf16.mxu1 %v4530_v47  ;;  %v4586_v46 = vcombine.high %v275_v37, %v279_v39  ;;  %v287_v47 = vld [vmem:[#allocation5 + $0x568] sm:$0xff]  ;;  %v4592_v50 = vcombine.high %v282_v43, %v286_v44  ;;  %v4591_v58 = vcombine.low %v282_v43, %v286_v44  ;;  %v338_v39 = vld [vmem:[#allocation5 + $0x700] sm:$0xff] }
  0xa5   :  { %v4593_v59 = vcombine.low %v283_v45, %v287_v47  ;;  %v343_v43 = vld [vmem:[#allocation5 + $0x728] sm:$0xff] }
  0xa7   :  { %1733 = vmatpush1.bf16.msra.mxu0 %v4527_v52  ;;  %1815 = vmatpush1.bf16.msra.mxu1 %v4529_v54  ;;  %v294_v52 = vld [vmem:[#allocation5 + $0x5a0] sm:$0xff]  ;;  %v291_v54 = vld [vmem:[#allocation5 + $0x588] sm:$0xff] }
  0xa8   :  { %1734 = vmatprep.subr.bf16.mxu0 %v4536_v55  ;;  %1816 = vmatprep.subr.bf16.mxu1 %v4538_v56  ;;  %v4594_v55 = vcombine.high %v283_v45, %v287_v47  ;;  %v295_v56 = vld [vmem:[#allocation5 + $0x5a8] sm:$0xff]  ;;  %v4600_v60 = vcombine.high %v290_v51, %v294_v52  ;;  %v4599_v2 = vcombine.low %v290_v51, %v294_v52  ;;  %v346_v47 = vld [vmem:[#allocation5 + $0x740] sm:$0xff] }
  0xa9   :  { %v4601_v3 = vcombine.low %v291_v54, %v295_v56  ;;  %v351_v51 = vld [vmem:[#allocation5 + $0x768] sm:$0xff] }
  0xab   :  { %1735 = vmatpush1.bf16.msra.mxu0 %v4535_v62  ;;  %1817 = vmatpush1.bf16.msra.mxu1 %v4537_v63  ;;  %v302_v62 = vld [vmem:[#allocation5 + $0x5e0] sm:$0xff]  ;;  %v299_v63 = vld [vmem:[#allocation5 + $0x5c8] sm:$0xff] }
  0xac   :  { %1736 = vmatprep.subr.bf16.mxu0 %v4544_v0  ;;  %1818 = vmatprep.subr.bf16.mxu1 %v4546_v1  ;;  %v4602_v0 = vcombine.high %v291_v54, %v295_v56  ;;  %v303_v1 = vld [vmem:[#allocation5 + $0x5e8] sm:$0xff]  ;;  %v4608_v4 = vcombine.high %v298_v61, %v302_v62  ;;  %v4607_v10 = vcombine.low %v298_v61, %v302_v62  ;;  %v354_v56 = vld [vmem:[#allocation5 + $0x780] sm:$0xff] }
  0xad   :  { %v4609_v11 = vcombine.low %v299_v63, %v303_v1  ;;  %v359_v61 = vld [vmem:[#allocation5 + $0x7a8] sm:$0xff] }
  0xaf   :  { %1737 = vmatpush1.bf16.msra.mxu0 %v4543_v6  ;;  %1819 = vmatpush1.bf16.msra.mxu1 %v4545_v7  ;;  %v310_v6 = vld [vmem:[#allocation5 + $0x620] sm:$0xff]  ;;  %v307_v7 = vld [vmem:[#allocation5 + $0x608] sm:$0xff] }
  0xb0   :  { %1747 = vmatprep.subr.bf16.mxu0 %v4552_v8  ;;  %1829 = vmatprep.subr.bf16.mxu1 %v4554_v9  ;;  %v4610_v8 = vcombine.high %v299_v63, %v303_v1  ;;  %v311_v9 = vld [vmem:[#allocation5 + $0x628] sm:$0xff]  ;;  %v4616_v13 = vcombine.high %v306_v5, %v310_v6  ;;  %v4615_v20 = vcombine.low %v306_v5, %v310_v6  ;;  %v362_v1 = vld [vmem:[#allocation5 + $0x7c0] sm:$0xff] }
  0xb1   :  { %v4617_v21 = vcombine.low %v307_v7, %v311_v9  ;;  %v367_v5 = vld [vmem:[#allocation5 + $0x7e8] sm:$0xff] }
  0xb2   :  { %1739 = vmatmul.mubr.bf16.vlgmr.msra.gmra.mrb[0].mxu0 %v5856_v12  ;;  %1821 = vmatmul.mubr.bf16.vlgmr.msra.gmra.mrb[0].mxu1 %v5856_v12 }
  0xb3   :  { %1748 = vmatpush1.bf16.msra.mxu0 %v4551_v16  ;;  %1830 = vmatpush1.bf16.msra.mxu1 %v4553_v17  ;;  %v318_v16 = vld [vmem:[#allocation5 + $0x660] sm:$0xff]  ;;  %v315_v17 = vld [vmem:[#allocation5 + $0x648] sm:$0xff] }
  0xb4   :  { %1749 = vmatprep.subr.bf16.mxu0 %v4560_v18  ;;  %1831 = vmatprep.subr.bf16.mxu1 %v4562_v22  ;;  %v4618_v18 = vcombine.high %v307_v7, %v311_v9  ;;  %v4624_v22 = vcombine.high %v314_v14, %v318_v16  ;;  %v4623_v28 = vcombine.low %v314_v14, %v318_v16  ;;  %v116_v9 = vld [vmem:[#allocation5 + $0x10] sm:$0xff]  ;;  %v121_v14 = vld [vmem:[#allocation5 + $0x38] sm:$0xff] }
  0xb5   :  { %1779 = vmatprep.mubr.bf16.mxu0 %v5862_v53  ;;  %1861 = vmatprep.mubr.bf16.mxu1 %v5862_v53  ;;  %v4625_v29 = vcombine.low %v315_v17, %v319_v19 }
  0xb7   :  { %1750 = vmatpush1.bf16.msra.mxu0 %v4559_v24  ;;  %1832 = vmatpush1.bf16.msra.mxu1 %v4561_v25  ;;  %v326_v24 = vld [vmem:[#allocation5 + $0x6a0] sm:$0xff]  ;;  %v323_v25 = vld [vmem:[#allocation5 + $0x688] sm:$0xff] }
  0xb8   :  { %1751 = vmatprep.subr.bf16.mxu0 %v4568_v26  ;;  %1833 = vmatprep.subr.bf16.mxu1 %v4570_v30  ;;  %v4626_v26 = vcombine.high %v315_v17, %v319_v19  ;;  %v4632_v30 = vcombine.high %v322_v23, %v326_v24  ;;  %v4631_v36 = vcombine.low %v322_v23, %v326_v24  ;;  %v124_v19 = vld [vmem:[#allocation5 + $0x50] sm:$0xff]  ;;  %v129_v23 = vld [vmem:[#allocation5 + $0x78] sm:$0xff] }
  0xb9   :  { %v4633_v37 = vcombine.low %v323_v25, %v327_v27  ;;  %v5870_v24 = vcombine.low %v5858_v15, %v5858_v15 }
  0xbb   :  { %1752 = vmatpush1.bf16.msra.mxu0 %v4567_v32  ;;  %1834 = vmatpush1.bf16.msra.mxu1 %v4569_v33  ;;  %v334_v32 = vld [vmem:[#allocation5 + $0x6e0] sm:$0xff]  ;;  %v331_v33 = vld [vmem:[#allocation5 + $0x6c8] sm:$0xff] }
  0xbc   :  { %1753 = vmatprep.subr.bf16.mxu0 %v4576_v34  ;;  %1835 = vmatprep.subr.bf16.mxu1 %v4578_v38  ;;  %v4634_v34 = vcombine.high %v323_v25, %v327_v27  ;;  %v4640_v38 = vcombine.high %v330_v31, %v334_v32  ;;  %v4639_v44 = vcombine.low %v330_v31, %v334_v32  ;;  %v136_v27 = vld [vmem:[#allocation5 + $0xb0] sm:$0xff]  ;;  %v137_v31 = vld [vmem:[#allocation5 + $0xb8] sm:$0xff] }
  0xbd   :  { %v4641_v45 = vcombine.low %v331_v33, %v335_v35 }
  0xbf   :  { %1754 = vmatpush1.bf16.msra.mxu0 %v4575_v40  ;;  %1836 = vmatpush1.bf16.msra.mxu1 %v4577_v41  ;;  %v342_v40 = vld [vmem:[#allocation5 + $0x720] sm:$0xff]  ;;  %v339_v41 = vld [vmem:[#allocation5 + $0x708] sm:$0xff] }
  0xc0   :  { %1755 = vmatprep.subr.bf16.mxu0 %v4584_v42  ;;  %1837 = vmatprep.subr.bf16.mxu1 %v4586_v46  ;;  %v4642_v42 = vcombine.high %v331_v33, %v335_v35  ;;  %v4648_v46 = vcombine.high %v338_v39, %v342_v40  ;;  %v4647_v52 = vcombine.low %v338_v39, %v342_v40  ;;  %v140_v35 = vld [vmem:[#allocation5 + $0xd0] sm:$0xff]  ;;  %v145_v39 = vld [vmem:[#allocation5 + $0xf8] sm:$0xff] }
  0xc1   :  { %v4649_v54 = vcombine.low %v339_v41, %v343_v43 }
  0xc3   :  { %1756 = vmatpush1.bf16.msra.mxu0 %v4583_v48  ;;  %1838 = vmatpush1.bf16.msra.mxu1 %v4585_v49  ;;  %v350_v48 = vld [vmem:[#allocation5 + $0x760] sm:$0xff]  ;;  %v347_v49 = vld [vmem:[#allocation5 + $0x748] sm:$0xff] }
  0xc4   :  { %1757 = vmatprep.subr.bf16.mxu0 %v4592_v50  ;;  %1839 = vmatprep.subr.bf16.mxu1 %v4594_v55  ;;  %v4650_v50 = vcombine.high %v339_v41, %v343_v43  ;;  %v4656_v55 = vcombine.high %v346_v47, %v350_v48  ;;  %v4655_v62 = vcombine.low %v346_v47, %v350_v48  ;;  %v148_v43 = vld [vmem:[#allocation5 + $0x110] sm:$0xff]  ;;  %v153_v47 = vld [vmem:[#allocation5 + $0x138] sm:$0xff] }
  0xc5   :  { %v4657_v63 = vcombine.low %v347_v49, %v351_v51 }
  0xc7   :  { %1758 = vmatpush1.bf16.msra.mxu0 %v4591_v58  ;;  %1840 = vmatpush1.bf16.msra.mxu1 %v4593_v59  ;;  %v358_v58 = vld [vmem:[#allocation5 + $0x7a0] sm:$0xff]  ;;  %v355_v59 = vld [vmem:[#allocation5 + $0x788] sm:$0xff] }
  0xc8   :  { %1759 = vmatprep.subr.bf16.mxu0 %v4600_v60  ;;  %1841 = vmatprep.subr.bf16.mxu1 %v4602_v0  ;;  %v4658_v60 = vcombine.high %v347_v49, %v351_v51  ;;  %v4664_v0 = vcombine.high %v354_v56, %v358_v58  ;;  %v4663_v6 = vcombine.low %v354_v56, %v358_v58  ;;  %v156_v51 = vld [vmem:[#allocation5 + $0x150] sm:$0xff] }
  0xc9   :  { %v4665_v7 = vcombine.low %v355_v59, %v359_v61 }
  0xcb   :  { %1760 = vmatpush1.bf16.msra.mxu0 %v4599_v2  ;;  %1842 = vmatpush1.bf16.msra.mxu1 %v4601_v3  ;;  %v366_v2 = vld [vmem:[#allocation5 + $0x7e0] sm:$0xff]  ;;  %v363_v3 = vld [vmem:[#allocation5 + $0x7c8] sm:$0xff] }
  0xcc   :  { %1761 = vmatprep.subr.bf16.mxu0 %v4608_v4  ;;  %1843 = vmatprep.subr.bf16.mxu1 %v4610_v8  ;;  %v4666_v4 = vcombine.high %v355_v59, %v359_v61  ;;  %v4672_v8 = vcombine.high %v362_v1, %v366_v2  ;;  %v4671_v16 = vcombine.low %v362_v1, %v366_v2  ;;  %v168_v61 = vld [vmem:[#allocation5 + $0x1b0] sm:$0xff] }
  0xcd   :  { %v4673_v17 = vcombine.low %v363_v3, %v367_v5 }
  0xcf   :  { %1762 = vmatpush1.bf16.msra.mxu0 %v4607_v10  ;;  %1844 = vmatpush1.bf16.msra.mxu1 %v4609_v11  ;;  %v120_v10 = vld [vmem:[#allocation5 + $0x30] sm:$0xff]  ;;  %v117_v11 = vld [vmem:[#allocation5 + $0x18] sm:$0xff] }
  0xd0   :  { %1763 = vmatprep.subr.bf16.mxu0 %v4616_v13  ;;  %1845 = vmatprep.subr.bf16.mxu1 %v4618_v18  ;;  %v4674_v13 = vcombine.high %v363_v3, %v367_v5  ;;  %v4428_v18 = vcombine.high %v116_v9, %v120_v10  ;;  %v4427_v25 = vcombine.low %v116_v9, %v120_v10  ;;  %v176_v5 = vld [vmem:[#allocation5 + $0x1f0] sm:$0xff] }
  0xd3   :  { %1764 = vmatpush1.bf16.msra.mxu0 %v4615_v20  ;;  %1846 = vmatpush1.bf16.msra.mxu1 %v4617_v21  ;;  %v128_v20 = vld [vmem:[#allocation5 + $0x70] sm:$0xff]  ;;  %v125_v21 = vld [vmem:[#allocation5 + $0x58] sm:$0xff] }
  0xd4   :  { %1765 = vmatprep.subr.bf16.mxu0 %v4624_v22  ;;  %1847 = vmatprep.subr.bf16.mxu1 %v4626_v26  ;;  %v4430_v22 = vcombine.high %v117_v11, %v121_v14  ;;  %v132_v26 = vld [vmem:[#allocation5 + $0x90] sm:$0xff]  ;;  %v4438_v32 = vcombine.high %v125_v21, %v129_v23  ;;  %v4435_v33 = vcombine.low %v124_v19, %v128_v20 }
  0xd5   :  { %v4437_v15 = vcombine.low %v125_v21, %v129_v23  ;;  %v4443_v40 = vcombine.low %v132_v26, %v136_v27  ;;  %v192_v23 = vld [vmem:[#allocation5 + $0x270] sm:$0xff] }
  0xd7   :  { %1766 = vmatpush1.bf16.msra.mxu0 %v4623_v28  ;;  %1848 = vmatpush1.bf16.msra.mxu1 %v4625_v29  ;;  %v4429_v28 = vcombine.low %v117_v11, %v121_v14  ;;  %v4436_v29 = vcombine.high %v124_v19, %v128_v20  ;;  %v184_v14 = vld [vmem:[#allocation5 + $0x230] sm:$0xff] }
  0xd8   :  { %1767 = vmatprep.subr.bf16.mxu0 %v4632_v30  ;;  %1849 = vmatprep.subr.bf16.mxu1 %v4634_v34  ;;  %v133_v30 = vld [vmem:[#allocation5 + $0x98] sm:$0xff]  ;;  %v4444_v34 = vcombine.high %v132_v26, %v136_v27 }
  0xd9   :  { %v4445_v41 = vcombine.low %v133_v30, %v137_v31  ;;  %v193_v27 = vld [vmem:[#allocation5 + $0x278] sm:$0xff] }
  0xdb   :  { %1768 = vmatpush1.bf16.msra.mxu0 %v4631_v36  ;;  %1850 = vmatpush1.bf16.msra.mxu1 %v4633_v37  ;;  %v144_v36 = vld [vmem:[#allocation5 + $0xf0] sm:$0xff]  ;;  %v4446_v37 = vcombine.high %v133_v30, %v137_v31 }
  0xdc   :  { %1769 = vmatprep.subr.bf16.mxu0 %v4640_v38  ;;  %1851 = vmatprep.subr.bf16.mxu1 %v4642_v42  ;;  %v141_v38 = vld [vmem:[#allocation5 + $0xd8] sm:$0xff]  ;;  %v4452_v42 = vcombine.high %v140_v35, %v144_v36  ;;  %v4451_v48 = vcombine.low %v140_v35, %v144_v36  ;;  %v196_v31 = vld [vmem:[#allocation5 + $0x290] sm:$0xff] }
  0xdd   :  { %v4453_v49 = vcombine.low %v141_v38, %v145_v39 }
  0xdf   :  { %1770 = vmatpush1.bf16.msra.mxu0 %v4639_v44  ;;  %1852 = vmatpush1.bf16.msra.mxu1 %v4641_v45  ;;  %v152_v44 = vld [vmem:[#allocation5 + $0x130] sm:$0xff]  ;;  %v149_v45 = vld [vmem:[#allocation5 + $0x118] sm:$0xff] }
  0xe0   :  { %1771 = vmatprep.subr.bf16.mxu0 %v4648_v46  ;;  %1853 = vmatprep.subr.bf16.mxu1 %v4650_v50  ;;  %v4454_v46 = vcombine.high %v141_v38, %v145_v39  ;;  %v4460_v50 = vcombine.high %v148_v43, %v152_v44  ;;  %v4459_v56 = vcombine.low %v148_v43, %v152_v44  ;;  %v204_v38 = vld [vmem:[#allocation5 + $0x2d0] sm:$0xff] }
  0xe1   :  { %v4461_v58 = vcombine.low %v149_v45, %v153_v47  ;;  %v208_v39 = vld [vmem:[#allocation5 + $0x2f0] sm:$0xff] }
  0xe3   :  { %1772 = vmatpush1.bf16.msra.mxu0 %v4647_v52  ;;  %1854 = vmatpush1.bf16.msra.mxu1 %v4649_v54  ;;  %v157_v52 = vld [vmem:[#allocation5 + $0x158] sm:$0xff]  ;;  %v4462_v54 = vcombine.high %v149_v45, %v153_v47  ;;  %v4516_v45 = vcombine.high %v204_v38, %v208_v39  ;;  %v216_v47 = vld [vmem:[#allocation5 + $0x330] sm:$0xff] }
  0xe4   :  { %1773 = vmatprep.subr.bf16.mxu0 %v4656_v55  ;;  %1855 = vmatprep.subr.bf16.mxu1 %v4658_v60  ;;  %v161_v55 = vld [vmem:[#allocation5 + $0x178] sm:$0xff]  ;;  %v164_v60 = vld [vmem:[#allocation5 + $0x190] sm:$0xff] }
  0xe5   :  { %v4469_v2 = vcombine.low %v157_v52, %v161_v55  ;;  %v4476_v3 = vcombine.high %v164_v60, %v168_v61  ;;  %v4475_v9 = vcombine.low %v164_v60, %v168_v61 }
  0xe7   :  { %1774 = vmatpush1.bf16.msra.mxu0 %v4655_v62  ;;  %1856 = vmatpush1.bf16.msra.mxu1 %v4657_v63  ;;  %v165_v62 = vld [vmem:[#allocation5 + $0x198] sm:$0xff]  ;;  %v4470_v63 = vcombine.high %v157_v52, %v161_v55  ;;  %v224_v55 = vld [vmem:[#allocation5 + $0x370] sm:$0xff] }
  0xe8   :  { %1775 = vmatprep.subr.bf16.mxu0 %v4664_v0  ;;  %1857 = vmatprep.subr.bf16.mxu1 %v4666_v4  ;;  %v169_v0 = vld [vmem:[#allocation5 + $0x1b8] sm:$0xff]  ;;  %v172_v4 = vld [vmem:[#allocation5 + $0x1d0] sm:$0xff] }
  0xe9   :  { %v4477_v10 = vcombine.low %v165_v62, %v169_v0  ;;  %v4484_v11 = vcombine.high %v172_v4, %v176_v5  ;;  %v4483_v19 = vcombine.low %v172_v4, %v176_v5 }
  0xeb   :  { %1776 = vmatpush1.bf16.msra.mxu0 %v4663_v6  ;;  %1858 = vmatpush1.bf16.msra.mxu1 %v4665_v7  ;;  %v173_v6 = vld [vmem:[#allocation5 + $0x1d8] sm:$0xff]  ;;  %v4478_v7 = vcombine.high %v165_v62, %v169_v0  ;;  %v232_v0 = vld [vmem:[#allocation5 + $0x3b0] sm:$0xff] }
  0xec   :  { %1777 = vmatprep.subr.bf16.mxu0 %v4672_v8  ;;  %1859 = vmatprep.subr.bf16.mxu1 %v4674_v13  ;;  %v177_v8 = vld [vmem:[#allocation5 + $0x1f8] sm:$0xff]  ;;  %v180_v13 = vld [vmem:[#allocation5 + $0x210] sm:$0xff] }
  0xed   :  { %v4485_v20 = vcombine.low %v173_v6, %v177_v8  ;;  %v4492_v21 = vcombine.high %v180_v13, %v184_v14 }
  0xef   :  { %1778 = vmatpush1.bf16.msra.mxu0 %v4671_v16  ;;  %1860 = vmatpush1.bf16.msra.mxu1 %v4673_v17  ;;  %v181_v16 = vld [vmem:[#allocation5 + $0x218] sm:$0xff]  ;;  %v4486_v17 = vcombine.high %v173_v6, %v177_v8  ;;  %v240_v8 = vld [vmem:[#allocation5 + $0x3f0] sm:$0xff] }
  0xf0   :  { %1870 = vmatprep.subr.bf16.mxu0 %v4428_v18  ;;  %1952 = vmatprep.subr.bf16.mxu1 %v4430_v22  ;;  %v185_v18 = vld [vmem:[#allocation5 + $0x238] sm:$0xff]  ;;  %v188_v22 = vld [vmem:[#allocation5 + $0x250] sm:$0xff] }
  0xf1   :  { %v4494_v26 = vcombine.high %v181_v16, %v185_v18  ;;  %v4500_v30 = vcombine.high %v188_v22, %v192_v23  ;;  %v4499_v35 = vcombine.low %v188_v22, %v192_v23  ;;  %v252_v23 = vld [vmem:[#allocation5 + $0x450] sm:$0xff] }
  0xf2   :  { %1780 = vmatmul.mubr.bf16.vlgmr.msra.gmra.mrb[0].mxu0 %v5870_v24  ;;  %1862 = vmatmul.mubr.bf16.vlgmr.msra.gmra.mrb[0].mxu1 %v5870_v24 }
  0xf3   :  { %1871 = vmatpush1.bf16.msra.mxu0 %v4427_v25  ;;  %1953 = vmatpush1.bf16.msra.mxu1 %v4429_v28  ;;  %v189_v25 = vld [vmem:[#allocation5 + $0x258] sm:$0xff]  ;;  %v4491_v28 = vcombine.low %v180_v13, %v184_v14  ;;  %v244_v14 = vld [vmem:[#allocation5 + $0x410] sm:$0xff] }
  0xf4   :  { %1872 = vmatprep.subr.bf16.mxu0 %v4436_v29  ;;  %1954 = vmatprep.subr.bf16.mxu1 %v4438_v32  ;;  %v4493_v29 = vcombine.low %v181_v16, %v185_v18  ;;  %v200_v32 = vld [vmem:[#allocation5 + $0x2b0] sm:$0xff]  ;;  %v4501_v36 = vcombine.low %v189_v25, %v193_v27 }
  0xf5   :  { %1902 = vmatprep.mubr.bf16.mxu0 %v5850_v57  ;;  %1984 = vmatprep.mubr.bf16.mxu1 %v5850_v57  ;;  %v160_v57 = vld [vmem:[#allocation5 + $0x170] sm:$0xff]  ;;  %v4507_v43 = vcombine.low %v196_v31, %v200_v32 }
  0xf6   :  { %v4468_v59 = vcombine.high %v156_v51, %v160_v57  ;;  %v4467_v1 = vcombine.low %v156_v51, %v160_v57  ;;  %v4515_v51 = vcombine.low %v204_v38, %v208_v39  ;;  %v248_v16 = vld [vmem:[#allocation5 + $0x430] sm:$0xff] }
  0xf7   :  { %1873 = vmatpush1.bf16.msra.mxu0 %v4435_v33  ;;  %1955 = vmatpush1.bf16.msra.mxu1 %v4437_v15  ;;  %v197_v33 = vld [vmem:[#allocation5 + $0x298] sm:$0xff]  ;;  %v4502_v15 = vcombine.high %v189_v25, %v193_v27  ;;  %v256_v25 = vld [vmem:[#allocation5 + $0x470] sm:$0xff]  ;;  %v4556_v27 = vcombine.high %v244_v14, %v248_v16 }
  0xf8   :  { %1874 = vmatprep.subr.bf16.mxu0 %v4444_v34  ;;  %1956 = vmatprep.subr.bf16.mxu1 %v4446_v37  ;;  %v201_v34 = vld [vmem:[#allocation5 + $0x2b8] sm:$0xff]  ;;  %v4508_v37 = vcombine.high %v196_v31, %v200_v32  ;;  %v4555_v31 = vcombine.low %v244_v14, %v248_v16  ;;  %v260_v32 = vld [vmem:[#allocation5 + $0x490] sm:$0xff]  ;;  %v4563_v38 = vcombine.low %v252_v23, %v256_v25 }
  0xf9   :  { %v4509_v44 = vcombine.low %v197_v33, %v201_v34  ;;  %v268_v39 = vld [vmem:[#allocation5 + $0x4d0] sm:$0xff] }
  0xfb   :  { %1875 = vmatpush1.bf16.msra.mxu0 %v4443_v40  ;;  %1957 = vmatpush1.bf16.msra.mxu1 %v4445_v41  ;;  %v205_v40 = vld [vmem:[#allocation5 + $0x2d8] sm:$0xff]  ;;  %v4510_v41 = vcombine.high %v197_v33, %v201_v34  ;;  %v264_v33 = vld [vmem:[#allocation5 + $0x4b0] sm:$0xff]  ;;  %v4564_v34 = vcombine.high %v252_v23, %v256_v25 }
  0xfc   :  { %1876 = vmatprep.subr.bf16.mxu0 %v4452_v42  ;;  %1958 = vmatprep.subr.bf16.mxu1 %v4454_v46  ;;  %v209_v42 = vld [vmem:[#allocation5 + $0x2f8] sm:$0xff]  ;;  %v212_v46 = vld [vmem:[#allocation5 + $0x310] sm:$0xff] }
  0xfd   :  { %v4517_v57 = vcombine.low %v205_v40, %v209_v42  ;;  %v4524_v52 = vcombine.high %v212_v46, %v216_v47  ;;  %v4523_v60 = vcombine.low %v212_v46, %v216_v47  ;;  %v4571_v46 = vcombine.low %v260_v32, %v264_v33  ;;  %v276_v47 = vld [vmem:[#allocation5 + $0x510] sm:$0xff] }
  0xff   :  { %1877 = vmatpush1.bf16.msra.mxu0 %v4451_v48  ;;  %1959 = vmatpush1.bf16.msra.mxu1 %v4453_v49  ;;  %v213_v48 = vld [vmem:[#allocation5 + $0x318] sm:$0xff]  ;;  %v4518_v49 = vcombine.high %v205_v40, %v209_v42  ;;  %v272_v40 = vld [vmem:[#allocation5 + $0x4f0] sm:$0xff]  ;;  %v4572_v42 = vcombine.high %v260_v32, %v264_v33 }
 0x100   :  { %1878 = vmatprep.subr.bf16.mxu0 %v4460_v50  ;;  %1960 = vmatprep.subr.bf16.mxu1 %v4462_v54  ;;  %v217_v50 = vld [vmem:[#allocation5 + $0x338] sm:$0xff]  ;;  %v220_v54 = vld [vmem:[#allocation5 + $0x350] sm:$0xff] }
 0x101   :  { %v4525_v61 = vcombine.low %v213_v48, %v217_v50  ;;  %v4532_v62 = vcombine.high %v220_v54, %v224_v55  ;;  %v4531_v4 = vcombine.low %v220_v54, %v224_v55  ;;  %v284_v54 = vld [vmem:[#allocation5 + $0x550] sm:$0xff] }
 0x102   :  { %v288_v55 = vld [vmem:[#allocation5 + $0x570] sm:$0xff] }
 0x103   :  { %1879 = vmatpush1.bf16.msra.mxu0 %v4459_v56  ;;  %1961 = vmatpush1.bf16.msra.mxu1 %v4461_v58  ;;  %v221_v56 = vld [vmem:[#allocation5 + $0x358] sm:$0xff]  ;;  %v4526_v58 = vcombine.high %v213_v48, %v217_v50  ;;  %v280_v48 = vld [vmem:[#allocation5 + $0x530] sm:$0xff] }
 0x104   :  { %1880 = vmatprep.subr.bf16.mxu0 %v4468_v59  ;;  %1962 = vmatprep.subr.bf16.mxu1 %v4470_v63  ;;  %v225_v59 = vld [vmem:[#allocation5 + $0x378] sm:$0xff]  ;;  %v228_v63 = vld [vmem:[#allocation5 + $0x390] sm:$0xff] }
 0x105   :  { %v4533_v5 = vcombine.low %v221_v56, %v225_v59  ;;  %v4540_v6 = vcombine.high %v228_v63, %v232_v0  ;;  %v4539_v13 = vcombine.low %v228_v63, %v232_v0  ;;  %v277_v50 = vld [vmem:[#allocation5 + $0x518] sm:$0xff]  ;;  %v296_v63 = vld [vmem:[#allocation5 + $0x5b0] sm:$0xff] }
 0x107   :  { %1881 = vmatpush1.bf16.msra.mxu0 %v4467_v1  ;;  %1963 = vmatpush1.bf16.msra.mxu1 %v4469_v2  ;;  %v229_v1 = vld [vmem:[#allocation5 + $0x398] sm:$0xff]  ;;  %v4534_v2 = vcombine.high %v221_v56, %v225_v59 }
 0x108   :  { %1882 = vmatprep.subr.bf16.mxu0 %v4476_v3  ;;  %1964 = vmatprep.subr.bf16.mxu1 %v4478_v7  ;;  %v233_v3 = vld [vmem:[#allocation5 + $0x3b8] sm:$0xff]  ;;  %v236_v7 = vld [vmem:[#allocation5 + $0x3d0] sm:$0xff] }
 0x109   :  { %v4548_v18 = vcombine.high %v236_v7, %v240_v8  ;;  %v4547_v22 = vcombine.low %v236_v7, %v240_v8  ;;  %v289_v59 = vld [vmem:[#allocation5 + $0x578] sm:$0xff]  ;;  %v300_v8 = vld [vmem:[#allocation5 + $0x5d0] sm:$0xff] }
 0x10b   :  { %1883 = vmatpush1.bf16.msra.mxu0 %v4475_v9  ;;  %1965 = vmatpush1.bf16.msra.mxu1 %v4477_v10  ;;  %v237_v9 = vld [vmem:[#allocation5 + $0x3d8] sm:$0xff]  ;;  %v4542_v10 = vcombine.high %v229_v1, %v233_v3 }
 0x10c   :  { %1884 = vmatprep.subr.bf16.mxu0 %v4484_v11  ;;  %1966 = vmatprep.subr.bf16.mxu1 %v4486_v17  ;;  %v241_v11 = vld [vmem:[#allocation5 + $0x3f8] sm:$0xff]  ;;  %v4541_v17 = vcombine.low %v229_v1, %v233_v3  ;;  %v4596_v1 = vcombine.high %v284_v54, %v288_v55 }
 0x10d   :  { %v297_v3 = vld [vmem:[#allocation5 + $0x5b8] sm:$0xff] }
 0x10f   :  { %1885 = vmatpush1.bf16.msra.mxu0 %v4483_v19  ;;  %1967 = vmatpush1.bf16.msra.mxu1 %v4485_v20  ;;  %v245_v19 = vld [vmem:[#allocation5 + $0x418] sm:$0xff] }
 0x110   :  { %1886 = vmatprep.subr.bf16.mxu0 %v4492_v21  ;;  %1968 = vmatprep.subr.bf16.mxu1 %v4494_v26  ;;  %v249_v20 = vld [vmem:[#allocation5 + $0x438] sm:$0xff]  ;;  %v4550_v21 = vcombine.high %v237_v9, %v241_v11  ;;  %v4549_v26 = vcombine.low %v237_v9, %v241_v11  ;;  %v304_v9 = vld [vmem:[#allocation5 + $0x5f0] sm:$0xff] }
 0x111   :  { %v301_v11 = vld [vmem:[#allocation5 + $0x5d8] sm:$0xff]  ;;  %v4611_v23 = vcombine.low %v300_v8, %v304_v9 }
 0x113   :  { %1887 = vmatpush1.bf16.msra.mxu0 %v4491_v28  ;;  %1969 = vmatpush1.bf16.msra.mxu1 %v4493_v29  ;;  %v253_v28 = vld [vmem:[#allocation5 + $0x458] sm:$0xff] }
 0x114   :  { %1888 = vmatprep.subr.bf16.mxu0 %v4500_v30  ;;  %1970 = vmatprep.subr.bf16.mxu1 %v4502_v15  ;;  %v257_v29 = vld [vmem:[#allocation5 + $0x478] sm:$0xff]  ;;  %v4558_v30 = vcombine.high %v245_v19, %v249_v20  ;;  %v4557_v15 = vcombine.low %v245_v19, %v249_v20  ;;  %v312_v19 = vld [vmem:[#allocation5 + $0x630] sm:$0xff] }
 0x117   :  { %1889 = vmatpush1.bf16.msra.mxu0 %v4499_v35  ;;  %1971 = vmatpush1.bf16.msra.mxu1 %v4501_v36  ;;  %v261_v35 = vld [vmem:[#allocation5 + $0x498] sm:$0xff] }
 0x118   :  { %1890 = vmatprep.subr.bf16.mxu0 %v4508_v37  ;;  %1972 = vmatprep.subr.bf16.mxu1 %v4510_v41  ;;  %v265_v36 = vld [vmem:[#allocation5 + $0x4b8] sm:$0xff]  ;;  %v4566_v37 = vcombine.high %v253_v28, %v257_v29  ;;  %v4565_v41 = vcombine.low %v253_v28, %v257_v29  ;;  %v316_v28 = vld [vmem:[#allocation5 + $0x650] sm:$0xff] }
 0x119   :  { %v320_v29 = vld [vmem:[#allocation5 + $0x670] sm:$0xff] }
 0x11b   :  { %1891 = vmatpush1.bf16.msra.mxu0 %v4507_v43  ;;  %1973 = vmatpush1.bf16.msra.mxu1 %v4509_v44  ;;  %v269_v43 = vld [vmem:[#allocation5 + $0x4d8] sm:$0xff] }
 0x11c   :  { %1892 = vmatprep.subr.bf16.mxu0 %v4516_v45  ;;  %1974 = vmatprep.subr.bf16.mxu1 %v4518_v49  ;;  %v273_v44 = vld [vmem:[#allocation5 + $0x4f8] sm:$0xff]  ;;  %v4574_v45 = vcombine.high %v261_v35, %v265_v36  ;;  %v4580_v49 = vcombine.high %v268_v39, %v272_v40 }
 0x11d   :  { %v4581_v56 = vcombine.low %v269_v43, %v273_v44 }
 0x11f   :  { %1893 = vmatpush1.bf16.msra.mxu0 %v4515_v51  ;;  %1975 = vmatpush1.bf16.msra.mxu1 %v4517_v57  ;;  %v281_v51 = vld [vmem:[#allocation5 + $0x538] sm:$0xff]  ;;  %v4582_v57 = vcombine.high %v269_v43, %v273_v44  ;;  %v332_v43 = vld [vmem:[#allocation5 + $0x6d0] sm:$0xff] }
 0x120   :  { %1894 = vmatprep.subr.bf16.mxu0 %v4524_v52  ;;  %1976 = vmatprep.subr.bf16.mxu1 %v4526_v58  ;;  %v4579_v52 = vcombine.low %v268_v39, %v272_v40  ;;  %v285_v58 = vld [vmem:[#allocation5 + $0x558] sm:$0xff]  ;;  %v4589_v0 = vcombine.low %v277_v50, %v281_v51  ;;  %v4627_v39 = vcombine.low %v316_v28, %v320_v29  ;;  %v336_v44 = vld [vmem:[#allocation5 + $0x6f0] sm:$0xff] }
 0x123   :  { %1895 = vmatpush1.bf16.msra.mxu0 %v4523_v60  ;;  %1977 = vmatpush1.bf16.msra.mxu1 %v4525_v61  ;;  %v4590_v60 = vcombine.high %v277_v50, %v281_v51  ;;  %v4587_v61 = vcombine.low %v276_v47, %v280_v48  ;;  %v340_v50 = vld [vmem:[#allocation5 + $0x710] sm:$0xff] }
 0x124   :  { %1896 = vmatprep.subr.bf16.mxu0 %v4532_v62  ;;  %1978 = vmatprep.subr.bf16.mxu1 %v4534_v2  ;;  %v292_v62 = vld [vmem:[#allocation5 + $0x590] sm:$0xff]  ;;  %v293_v2 = vld [vmem:[#allocation5 + $0x598] sm:$0xff] }
 0x125   :  { %v4604_v7 = vcombine.high %v292_v62, %v296_v63  ;;  %v4603_v14 = vcombine.low %v292_v62, %v296_v63  ;;  %v4605_v16 = vcombine.low %v293_v2, %v297_v3  ;;  %v344_v51 = vld [vmem:[#allocation5 + $0x730] sm:$0xff] }
 0x126   :  { %v4651_v62 = vcombine.low %v340_v50, %v344_v51 }
 0x127   :  { %1897 = vmatpush1.bf16.msra.mxu0 %v4531_v4  ;;  %1979 = vmatpush1.bf16.msra.mxu1 %v4533_v5  ;;  %v4598_v4 = vcombine.high %v285_v58, %v289_v59  ;;  %v4595_v5 = vcombine.low %v284_v54, %v288_v55  ;;  %v4643_v54 = vcombine.low %v332_v43, %v336_v44 }
 0x128   :  { %1898 = vmatprep.subr.bf16.mxu0 %v4540_v6  ;;  %1980 = vmatprep.subr.bf16.mxu1 %v4542_v10  ;;  %v4597_v6 = vcombine.low %v285_v58, %v289_v59  ;;  %v4606_v10 = vcombine.high %v293_v2, %v297_v3  ;;  %v348_v58 = vld [vmem:[#allocation5 + $0x750] sm:$0xff] }
 0x129   :  { %v352_v59 = vld [vmem:[#allocation5 + $0x770] sm:$0xff] }
 0x12a   :  { %v356_v2 = vld [vmem:[#allocation5 + $0x790] sm:$0xff] }
 0x12b   :  { %1899 = vmatpush1.bf16.msra.mxu0 %v4539_v13  ;;  %1981 = vmatpush1.bf16.msra.mxu1 %v4541_v17  ;;  %v305_v13 = vld [vmem:[#allocation5 + $0x5f8] sm:$0xff]  ;;  %v4612_v17 = vcombine.high %v300_v8, %v304_v9  ;;  %v360_v3 = vld [vmem:[#allocation5 + $0x7b0] sm:$0xff] }
 0x12c   :  { %1900 = vmatprep.subr.bf16.mxu0 %v4548_v18  ;;  %1982 = vmatprep.subr.bf16.mxu1 %v4550_v21  ;;  %v308_v18 = vld [vmem:[#allocation5 + $0x610] sm:$0xff]  ;;  %v4614_v20 = vcombine.high %v301_v11, %v305_v13  ;;  %v309_v21 = vld [vmem:[#allocation5 + $0x618] sm:$0xff]  ;;  %v4613_v25 = vcombine.low %v301_v11, %v305_v13  ;;  %v4668_v8 = vcombine.high %v356_v2, %v360_v3 }
 0x12d   :  { %v4619_v32 = vcombine.low %v308_v18, %v312_v19  ;;  %v368_v11 = vld [vmem:[#allocation5 + $0x7f0] sm:$0xff]  ;;  %v365_v13 = vld [vmem:[#allocation5 + $0x7d8] sm:$0xff] }
 0x12f   :  { %1901 = vmatpush1.bf16.msra.mxu0 %v4547_v22  ;;  %1983 = vmatpush1.bf16.msra.mxu1 %v4549_v26  ;;  %v313_v22 = vld [vmem:[#allocation5 + $0x638] sm:$0xff]  ;;  %v4620_v26 = vcombine.high %v308_v18, %v312_v19 }
 0x130   :  { %1911 = vmatprep.subr.bf16.mxu0 %v4556_v27  ;;  %1993 = vmatprep.subr.bf16.mxu1 %v4558_v30  ;;  %v4622_v27 = vcombine.high %v309_v21, %v313_v22  ;;  %v317_v30 = vld [vmem:[#allocation5 + $0x658] sm:$0xff]  ;;  %v4621_v33 = vcombine.low %v309_v21, %v313_v22 }
 0x131   :  { %v5123_v22 = vld [vmem:[#allocation8 + $0x4] ss:$16 sps:$4 sm:$0xff]  }
 0x132   :  { %1903 = vmatmul.mubr.bf16.vlgmr.msra.gmra.mrb[4].mxu0 %v5856_v12  ;;  %1985 = vmatmul.mubr.bf16.vlgmr.msra.gmra.mrb[4].mxu1 %v5856_v12  ;;  %v4573_v12 = vcombine.low %v261_v35, %v265_v36  ;;  %v324_v35 = vld [vmem:[#allocation5 + $0x690] sm:$0xff] }
 0x133   :  { %1912 = vmatpush1.bf16.msra.mxu0 %v4555_v31  ;;  %1994 = vmatpush1.bf16.msra.mxu1 %v4557_v15  ;;  %v321_v31 = vld [vmem:[#allocation5 + $0x678] sm:$0xff]  ;;  %v4628_v15 = vcombine.high %v316_v28, %v320_v29  ;;  %v328_v36 = vld [vmem:[#allocation5 + $0x6b0] sm:$0xff] }
 0x134   :  { %1913 = vmatprep.subr.bf16.mxu0 %v4564_v34  ;;  %1995 = vmatprep.subr.bf16.mxu1 %v4566_v37  ;;  %v4630_v34 = vcombine.high %v317_v30, %v321_v31  ;;  %v325_v37 = vld [vmem:[#allocation5 + $0x698] sm:$0xff]  ;;  %v4629_v40 = vcombine.low %v317_v30, %v321_v31  ;;  %v5132_v28 = vld [vmem:[#allocation8 + $0x2c] ss:$16 sps:$4 sm:$0xff]   ;;  %v5130_v30 = vld [vmem:[#allocation8 + $0x28] ss:$16 sps:$4 sm:$0xff]  }
 0x135   :  { %1943 = vmatprep.mubr.bf16.mxu0 %v5862_v53  ;;  %2025 = vmatprep.mubr.bf16.mxu1 %v5862_v53  ;;  %v4588_v53 = vcombine.high %v276_v47, %v280_v48  ;;  %v4635_v47 = vcombine.low %v324_v35, %v328_v36  ;;  %v5127_v29 = vld [vmem:[#allocation8 + $0x20] ss:$16 sps:$4 sm:$0xff]   ;;  %v5135_v31 = vld [vmem:[#allocation8 + $0x44] ss:$16 sps:$4 sm:$0xff]  }
 0x137   :  { %1914 = vmatpush1.bf16.msra.mxu0 %v4563_v38  ;;  %1996 = vmatpush1.bf16.msra.mxu1 %v4565_v41  ;;  %v329_v38 = vld [vmem:[#allocation5 + $0x6b8] sm:$0xff]  ;;  %v4636_v41 = vcombine.high %v324_v35, %v328_v36  ;;  %v5144_v35 = vld [vmem:[#allocation8 + $0x6c] ss:$16 sps:$4 sm:$0xff]  }
 0x138   :  { %1915 = vmatprep.subr.bf16.mxu0 %v4572_v42  ;;  %1997 = vmatprep.subr.bf16.mxu1 %v4574_v45  ;;  %v4638_v42 = vcombine.high %v325_v37, %v329_v38  ;;  %v333_v45 = vld [vmem:[#allocation5 + $0x6d8] sm:$0xff]  ;;  %v4637_v48 = vcombine.low %v325_v37, %v329_v38  ;;  %v5150_v38 = vld [vmem:[#allocation8 + $0x8c] ss:$16 sps:$4 sm:$0xff]  }
 0x139   :  { %v5139_v36 = vld [vmem:[#allocation8 + $0x60] ss:$16 sps:$4 sm:$0xff]   ;;  %v5147_v37 = vld [vmem:[#allocation8 + $0x84] ss:$16 sps:$4 sm:$0xff]  }
 0x13b   :  { %1916 = vmatpush1.bf16.msra.mxu0 %v4571_v46  ;;  %1998 = vmatpush1.bf16.msra.mxu1 %v4573_v12  ;;  %v337_v46 = vld [vmem:[#allocation5 + $0x6f8] sm:$0xff]  ;;  %v4644_v12 = vcombine.high %v332_v43, %v336_v44  ;;  %v5154_v44 = vld [vmem:[#allocation8 + $0xa8] ss:$16 sps:$4 sm:$0xff]  }
 0x13c   :  { %1917 = vmatprep.subr.bf16.mxu0 %v4580_v49  ;;  %1999 = vmatprep.subr.bf16.mxu1 %v4582_v57  ;;  %v4646_v49 = vcombine.high %v333_v45, %v337_v46  ;;  %v341_v57 = vld [vmem:[#allocation5 + $0x718] sm:$0xff]  ;;  %v4645_v55 = vcombine.low %v333_v45, %v337_v46  ;;  %v5162_v46 = vld [vmem:[#allocation8 + $0xcc] ss:$16 sps:$4 sm:$0xff]  }
 0x13d   :  { %v5151_v43 = vld [vmem:[#allocation8 + $0xa0] ss:$16 sps:$4 sm:$0xff]   ;;  %v5159_v45 = vld [vmem:[#allocation8 + $0xc4] ss:$16 sps:$4 sm:$0xff]  }
 0x13f   :  { %1918 = vmatpush1.bf16.msra.mxu0 %v4579_v52  ;;  %2000 = vmatpush1.bf16.msra.mxu1 %v4581_v56  ;;  %v345_v52 = vld [vmem:[#allocation5 + $0x738] sm:$0xff]  ;;  %v4652_v56 = vcombine.high %v340_v50, %v344_v51  ;;  %v5166_v51 = vld [vmem:[#allocation8 + $0xe8] ss:$16 sps:$4 sm:$0xff]  }
 0x140   :  { %1919 = vmatprep.subr.bf16.mxu0 %v4588_v53  ;;  %2001 = vmatprep.subr.bf16.mxu1 %v4590_v60  ;;  %v4654_v53 = vcombine.high %v341_v57, %v345_v52  ;;  %v349_v60 = vld [vmem:[#allocation5 + $0x758] sm:$0xff]  ;;  %v4653_v63 = vcombine.low %v341_v57, %v345_v52  ;;  %v5174_v52 = vld [vmem:[#allocation8 + $0x10c] ss:$16 sps:$4 sm:$0xff]  }
 0x141   :  { %v5163_v50 = vld [vmem:[#allocation8 + $0xe0] ss:$16 sps:$4 sm:$0xff]   ;;  %v5171_v57 = vld [vmem:[#allocation8 + $0x104] ss:$16 sps:$4 sm:$0xff]  }
 0x143   :  { %1920 = vmatpush1.bf16.msra.mxu0 %v4587_v61  ;;  %2002 = vmatpush1.bf16.msra.mxu1 %v4589_v0  ;;  %v353_v61 = vld [vmem:[#allocation5 + $0x778] sm:$0xff]  ;;  %v4660_v0 = vcombine.high %v348_v58, %v352_v59 }
 0x144   :  { %1921 = vmatprep.subr.bf16.mxu0 %v4596_v1  ;;  %2003 = vmatprep.subr.bf16.mxu1 %v4598_v4  ;;  %v4662_v1 = vcombine.high %v349_v60, %v353_v61  ;;  %v357_v4 = vld [vmem:[#allocation5 + $0x798] sm:$0xff] }
 0x147   :  { %1922 = vmatpush1.bf16.msra.mxu0 %v4595_v5  ;;  %2004 = vmatpush1.bf16.msra.mxu1 %v4597_v6  ;;  %v361_v5 = vld [vmem:[#allocation5 + $0x7b8] sm:$0xff]  ;;  %v4659_v6 = vcombine.low %v348_v58, %v352_v59  ;;  %v5178_v59 = vld [vmem:[#allocation8 + $0x128] ss:$16 sps:$4 sm:$0xff]  }
 0x148   :  { %1923 = vmatprep.subr.bf16.mxu0 %v4604_v7  ;;  %2005 = vmatprep.subr.bf16.mxu1 %v4606_v10  ;;  %v4661_v7 = vcombine.low %v349_v60, %v353_v61  ;;  %v4670_v9 = vcombine.high %v357_v4, %v361_v5  ;;  %v364_v10 = vld [vmem:[#allocation5 + $0x7d0] sm:$0xff]  ;;  %v5175_v58 = vld [vmem:[#allocation8 + $0x120] ss:$16 sps:$4 sm:$0xff]   ;;  %v5183_v60 = vld [vmem:[#allocation8 + $0x144] ss:$16 sps:$4 sm:$0xff]  }
 0x149   :  { %v4676_v18 = vcombine.high %v364_v10, %v368_v11  ;;  %v5186_v61 = vld [vmem:[#allocation8 + $0x14c] ss:$16 sps:$4 sm:$0xff]  }
 0x14b   :  { %1924 = vmatpush1.bf16.msra.mxu0 %v4603_v14  ;;  %2006 = vmatpush1.bf16.msra.mxu1 %v4605_v16  ;;  %v369_v14 = vld [vmem:[#allocation5 + $0x7f8] sm:$0xff]  ;;  %v4667_v16 = vcombine.low %v356_v2, %v360_v3  ;;  %v5190_v3 = vld [vmem:[#allocation8 + $0x168] ss:$16 sps:$4 sm:$0xff]  }
 0x14c   :  { %1925 = vmatprep.subr.bf16.mxu0 %v4612_v17  ;;  %2007 = vmatprep.subr.bf16.mxu1 %v4614_v20  ;;  %v4669_v17 = vcombine.low %v357_v4, %v361_v5  ;;  %v4678_v19 = vcombine.high %v365_v13, %v369_v14  ;;  %v4675_v20 = vcombine.low %v364_v10, %v368_v11  ;;  %v5187_v2 = vld [vmem:[#allocation8 + $0x160] ss:$16 sps:$4 sm:$0xff]   ;;  %v5195_v4 = vld [vmem:[#allocation8 + $0x184] ss:$16 sps:$4 sm:$0xff]   ;;  %v5198_v5 = vld [vmem:[#allocation8 + $0x18c] ss:$16 sps:$4 sm:$0xff]  }
 0x14d   :  { %v4677_v21 = vcombine.low %v365_v13, %v369_v14  ;;  %v5199_v10 = vld [vmem:[#allocation8 + $0x1a0] ss:$16 sps:$4 sm:$0xff]   ;;  %v5202_v11 = vld [vmem:[#allocation8 + $0x1a8] ss:$16 sps:$4 sm:$0xff]   ;;  %v5207_v13 = vld [vmem:[#allocation8 + $0x1c4] ss:$16 sps:$4 sm:$0xff]  }
 0x14e   :  { %v5210_v14 = vld [vmem:[#allocation8 + $0x1cc] ss:$16 sps:$4 sm:$0xff]  }
 0x14f   :  { %1926 = vmatpush1.bf16.msra.mxu0 %v4611_v23  ;;  %2008 = vmatpush1.bf16.msra.mxu1 %v4613_v25  ;;  %v5126_v23 = vld [vmem:[#allocation8 + $0xc] ss:$16 sps:$4 sm:$0xff]   ;;  %v5121_v25 = vld [vmem:[#allocation8] ss:$16 sps:$4 sm:$0xff]  }
 0x150   :  { %1927 = vmatprep.subr.bf16.mxu0 %v4620_v26  ;;  %2009 = vmatprep.subr.bf16.mxu1 %v4622_v27  ;;  %v5124_v26 = vld [vmem:[#allocation8 + $0x8] ss:$16 sps:$4 sm:$0xff]   ;;  %v5129_v27 = vld [vmem:[#allocation8 + $0x24] ss:$16 sps:$4 sm:$0xff]  }
 0x153   :  { %1928 = vmatpush1.bf16.msra.mxu0 %v4619_v32  ;;  %2010 = vmatpush1.bf16.msra.mxu1 %v4621_v33  ;;  %v5138_v32 = vld [vmem:[#allocation8 + $0x4c] ss:$16 sps:$4 sm:$0xff]   ;;  %v5133_v33 = vld [vmem:[#allocation8 + $0x40] ss:$16 sps:$4 sm:$0xff]  }
 0x154   :  { %1929 = vmatprep.subr.bf16.mxu0 %v4628_v15  ;;  %2011 = vmatprep.subr.bf16.mxu1 %v4630_v34  ;;  %v5136_v15 = vld [vmem:[#allocation8 + $0x48] ss:$16 sps:$4 sm:$0xff]   ;;  %v5141_v34 = vld [vmem:[#allocation8 + $0x64] ss:$16 sps:$4 sm:$0xff]  }
 0x157   :  { %1930 = vmatpush1.bf16.msra.mxu0 %v4627_v39  ;;  %2012 = vmatpush1.bf16.msra.mxu1 %v4629_v40  ;;  %v5145_v39 = vld [vmem:[#allocation8 + $0x80] ss:$16 sps:$4 sm:$0xff]   ;;  %v5148_v40 = vld [vmem:[#allocation8 + $0x88] ss:$16 sps:$4 sm:$0xff]  }
 0x158   :  { %1931 = vmatprep.subr.bf16.mxu0 %v4636_v41  ;;  %2013 = vmatprep.subr.bf16.mxu1 %v4638_v42  ;;  %v5153_v41 = vld [vmem:[#allocation8 + $0xa4] ss:$16 sps:$4 sm:$0xff]   ;;  %v5156_v42 = vld [vmem:[#allocation8 + $0xac] ss:$16 sps:$4 sm:$0xff]  }
 0x15b   :  { %1932 = vmatpush1.bf16.msra.mxu0 %v4635_v47  ;;  %2014 = vmatpush1.bf16.msra.mxu1 %v4637_v48  ;;  %v5157_v47 = vld [vmem:[#allocation8 + $0xc0] ss:$16 sps:$4 sm:$0xff]   ;;  %v5160_v48 = vld [vmem:[#allocation8 + $0xc8] ss:$16 sps:$4 sm:$0xff]  }
 0x15c   :  { %1933 = vmatprep.subr.bf16.mxu0 %v4644_v12  ;;  %2015 = vmatprep.subr.bf16.mxu1 %v4646_v49  ;;  %v5165_v12 = vld [vmem:[#allocation8 + $0xe4] ss:$16 sps:$4 sm:$0xff]   ;;  %v5168_v49 = vld [vmem:[#allocation8 + $0xec] ss:$16 sps:$4 sm:$0xff]  }
 0x15f   :  { %1934 = vmatpush1.bf16.msra.mxu0 %v4643_v54  ;;  %2016 = vmatpush1.bf16.msra.mxu1 %v4645_v55  ;;  %v5169_v54 = vld [vmem:[#allocation8 + $0x100] ss:$16 sps:$4 sm:$0xff]   ;;  %v5172_v55 = vld [vmem:[#allocation8 + $0x108] ss:$16 sps:$4 sm:$0xff]  }
 0x160   :  { %1935 = vmatprep.subr.bf16.mxu0 %v4652_v56  ;;  %2017 = vmatprep.subr.bf16.mxu1 %v4654_v53  ;;  %v5177_v56 = vld [vmem:[#allocation8 + $0x124] ss:$16 sps:$4 sm:$0xff]   ;;  %v5180_v53 = vld [vmem:[#allocation8 + $0x12c] ss:$16 sps:$4 sm:$0xff]  }
 0x163   :  { %1936 = vmatpush1.bf16.msra.mxu0 %v4651_v62  ;;  %2018 = vmatpush1.bf16.msra.mxu1 %v4653_v63  ;;  %v5181_v62 = vld [vmem:[#allocation8 + $0x140] ss:$16 sps:$4 sm:$0xff]   ;;  %v5184_v63 = vld [vmem:[#allocation8 + $0x148] ss:$16 sps:$4 sm:$0xff]  }
 0x164   :  { %1937 = vmatprep.subr.bf16.mxu0 %v4660_v0  ;;  %2019 = vmatprep.subr.bf16.mxu1 %v4662_v1  ;;  %v5189_v0 = vld [vmem:[#allocation8 + $0x164] ss:$16 sps:$4 sm:$0xff]   ;;  %v5192_v1 = vld [vmem:[#allocation8 + $0x16c] ss:$16 sps:$4 sm:$0xff]  }
 0x167   :  { %1938 = vmatpush1.bf16.msra.mxu0 %v4659_v6  ;;  %2020 = vmatpush1.bf16.msra.mxu1 %v4661_v7  ;;  %v5193_v6 = vld [vmem:[#allocation8 + $0x180] ss:$16 sps:$4 sm:$0xff]   ;;  %v5196_v7 = vld [vmem:[#allocation8 + $0x188] ss:$16 sps:$4 sm:$0xff]  }
 0x168   :  { %1939 = vmatprep.subr.bf16.mxu0 %v4668_v8  ;;  %2021 = vmatprep.subr.bf16.mxu1 %v4670_v9  ;;  %v5201_v8 = vld [vmem:[#allocation8 + $0x1a4] ss:$16 sps:$4 sm:$0xff]   ;;  %v5204_v9 = vld [vmem:[#allocation8 + $0x1ac] ss:$16 sps:$4 sm:$0xff]  }
 0x16b   :  { %1940 = vmatpush1.bf16.msra.mxu0 %v4667_v16  ;;  %2022 = vmatpush1.bf16.msra.mxu1 %v4669_v17  ;;  %v5205_v16 = vld [vmem:[#allocation8 + $0x1c0] ss:$16 sps:$4 sm:$0xff]   ;;  %v5208_v17 = vld [vmem:[#allocation8 + $0x1c8] ss:$16 sps:$4 sm:$0xff]  }
 0x16c   :  { %1941 = vmatprep.subr.bf16.mxu0 %v4676_v18  ;;  %2023 = vmatprep.subr.bf16.mxu1 %v4678_v19  ;;  %v5213_v18 = vld [vmem:[#allocation8 + $0x1e4] ss:$16 sps:$4 sm:$0xff]   ;;  %v5216_v19 = vld [vmem:[#allocation8 + $0x1ec] ss:$16 sps:$4 sm:$0xff]  }
 0x16f   :  { %1942 = vmatpush1.bf16.msra.mxu0 %v4675_v20  ;;  %2024 = vmatpush1.bf16.msra.mxu1 %v4677_v21  ;;  %v5211_v20 = vld [vmem:[#allocation8 + $0x1e0] ss:$16 sps:$4 sm:$0xff]   ;;  %v5214_v21 = vld [vmem:[#allocation8 + $0x1e8] ss:$16 sps:$4 sm:$0xff]  }
 0x170   :  { %3608 = vmatprep.subr.bf16.mxu0 %v5123_v22  ;;  %3772 = vmatprep.subr.bf16.mxu1 %v5126_v23  ;;  %v5219_v22 = vld [vmem:[#allocation8 + $0x204] ss:$16 sps:$4 sm:$0xff]   ;;  %v5222_v23 = vld [vmem:[#allocation8 + $0x20c] ss:$16 sps:$4 sm:$0xff]  }
 0x172   :  { %1944 = vmatmul.mubr.bf16.vlgmr.msra.gmra.mrb[4].mxu0 %v5870_v24  ;;  %2026 = vmatmul.mubr.bf16.vlgmr.msra.gmra.mrb[4].mxu1 %v5870_v24  ;;  %v5142_v24 = vld [vmem:[#allocation8 + $0x68] ss:$16 sps:$4 sm:$0xff]  }
 0x173   :  { %3609 = vmatpush1.bf16.msra.mxu0 %v5121_v25  ;;  %3773 = vmatpush1.bf16.msra.mxu1 %v5124_v26  ;;  %v372_v25 = vlaneseq }
 0x174   :  { %3610 = vmatprep.subr.bf16.mxu0 %v5129_v27  ;;  %3774 = vmatprep.subr.bf16.mxu1 %v5132_v28  ;;  %v5885_v28 = vld [vmem:[#allocation7] sm:$0xff] }
 0x175   :  { %v5882_v26 = vshrl.u32 %v372_v25, 7  ;;  %v5279_v25 = vld [vmem:[#allocation8 + $0x344] ss:$16 sps:$4 sm:$0xff]  }
 0x177   :  { %3611 = vmatpush1.bf16.msra.mxu0 %v5127_v29  ;;  %3775 = vmatpush1.bf16.msra.mxu1 %v5130_v30  ;;  %v374_v27 = vsub.s32 0, %v5882_v26  ;;  %v378_v29 = vsub.s32 1, %v5882_v26  ;;  %v386_v30 = vsub.s32 3, %v5882_v26 }
 0x178   :  { %3612 = vmatprep.subr.bf16.mxu0 %v5135_v31  ;;  %3776 = vmatprep.subr.bf16.mxu1 %v5138_v32 }
 0x179   :  { %v375_v31 = vrot.slane %v5885_v28, %v374_v27  ;;  %v379_v32 = vrot.slane %v5885_v28, %v378_v29 }
 0x17b   :  { %3613 = vmatpush1.bf16.msra.mxu0 %v5133_v33  ;;  %3777 = vmatpush1.bf16.msra.mxu1 %v5136_v15  ;;  %v387_v33 = vrot.slane %v5885_v28, %v386_v30 }
 0x17c   :  { %3614 = vmatprep.subr.bf16.mxu0 %v5141_v34  ;;  %3778 = vmatprep.subr.bf16.mxu1 %v5144_v35 }
 0x17f   :  { %3615 = vmatpush1.bf16.msra.mxu0 %v5139_v36  ;;  %3779 = vmatpush1.bf16.msra.mxu1 %v5142_v24 }
 0x180   :  { %3616 = vmatprep.subr.bf16.mxu0 %v5147_v37  ;;  %3780 = vmatprep.subr.bf16.mxu1 %v5150_v38 }
 0x183   :  { %3617 = vmatpush1.bf16.msra.mxu0 %v5145_v39  ;;  %3781 = vmatpush1.bf16.msra.mxu1 %v5148_v40 }
 0x184   :  { %3618 = vmatprep.subr.bf16.mxu0 %v5153_v41  ;;  %3782 = vmatprep.subr.bf16.mxu1 %v5156_v42 }
 0x187   :  { %3619 = vmatpush1.bf16.msra.mxu0 %v5151_v43  ;;  %3783 = vmatpush1.bf16.msra.mxu1 %v5154_v44 }
 0x188   :  { %3620 = vmatprep.subr.bf16.mxu0 %v5159_v45  ;;  %3784 = vmatprep.subr.bf16.mxu1 %v5162_v46 }
 0x18b   :  { %3621 = vmatpush1.bf16.msra.mxu0 %v5157_v47  ;;  %3785 = vmatpush1.bf16.msra.mxu1 %v5160_v48  ;;  %v5217_v47 = vld [vmem:[#allocation8 + $0x200] ss:$16 sps:$4 sm:$0xff]   ;;  %v5220_v48 = vld [vmem:[#allocation8 + $0x208] ss:$16 sps:$4 sm:$0xff]  }
 0x18c   :  { %3622 = vmatprep.subr.bf16.mxu0 %v5165_v12  ;;  %3786 = vmatprep.subr.bf16.mxu1 %v5168_v49  ;;  %v5225_v49 = vld [vmem:[#allocation8 + $0x224] ss:$16 sps:$4 sm:$0xff]  }
 0x18f   :  { %3623 = vmatpush1.bf16.msra.mxu0 %v5163_v50  ;;  %3787 = vmatpush1.bf16.msra.mxu1 %v5166_v51  ;;  %v5228_v50 = vld [vmem:[#allocation8 + $0x22c] ss:$16 sps:$4 sm:$0xff]  }
 0x190   :  { %3624 = vmatprep.subr.bf16.mxu0 %v5171_v57  ;;  %3788 = vmatprep.subr.bf16.mxu1 %v5174_v52  ;;  %v5223_v57 = vld [vmem:[#allocation8 + $0x220] ss:$16 sps:$4 sm:$0xff]   ;;  %v5226_v52 = vld [vmem:[#allocation8 + $0x228] ss:$16 sps:$4 sm:$0xff]  }
 0x193   :  { %3625 = vmatpush1.bf16.msra.mxu0 %v5169_v54  ;;  %3789 = vmatpush1.bf16.msra.mxu1 %v5172_v55  ;;  %v5231_v54 = vld [vmem:[#allocation8 + $0x244] ss:$16 sps:$4 sm:$0xff]   ;;  %v5234_v55 = vld [vmem:[#allocation8 + $0x24c] ss:$16 sps:$4 sm:$0xff]  }
 0x194   :  { %3626 = vmatprep.subr.bf16.mxu0 %v5177_v56  ;;  %3790 = vmatprep.subr.bf16.mxu1 %v5180_v53  ;;  %v5229_v56 = vld [vmem:[#allocation8 + $0x240] ss:$16 sps:$4 sm:$0xff]   ;;  %v5232_v53 = vld [vmem:[#allocation8 + $0x248] ss:$16 sps:$4 sm:$0xff]  }
 0x197   :  { %3627 = vmatpush1.bf16.msra.mxu0 %v5175_v58  ;;  %3791 = vmatpush1.bf16.msra.mxu1 %v5178_v59  ;;  %v5237_v58 = vld [vmem:[#allocation8 + $0x264] ss:$16 sps:$4 sm:$0xff]   ;;  %v5240_v59 = vld [vmem:[#allocation8 + $0x26c] ss:$16 sps:$4 sm:$0xff]  }
 0x198   :  { %3628 = vmatprep.subr.bf16.mxu0 %v5183_v60  ;;  %3792 = vmatprep.subr.bf16.mxu1 %v5186_v61  ;;  %v5235_v60 = vld [vmem:[#allocation8 + $0x260] ss:$16 sps:$4 sm:$0xff]   ;;  %v5238_v61 = vld [vmem:[#allocation8 + $0x268] ss:$16 sps:$4 sm:$0xff]  }
 0x19b   :  { %3629 = vmatpush1.bf16.msra.mxu0 %v5181_v62  ;;  %3793 = vmatpush1.bf16.msra.mxu1 %v5184_v63  ;;  %v5243_v62 = vld [vmem:[#allocation8 + $0x284] ss:$16 sps:$4 sm:$0xff]   ;;  %v5246_v63 = vld [vmem:[#allocation8 + $0x28c] ss:$16 sps:$4 sm:$0xff]  }
 0x19c   :  { %3630 = vmatprep.subr.bf16.mxu0 %v5189_v0  ;;  %3794 = vmatprep.subr.bf16.mxu1 %v5192_v1  ;;  %v5241_v0 = vld [vmem:[#allocation8 + $0x280] ss:$16 sps:$4 sm:$0xff]   ;;  %v5244_v1 = vld [vmem:[#allocation8 + $0x288] ss:$16 sps:$4 sm:$0xff]  }
 0x19f   :  { %3631 = vmatpush1.bf16.msra.mxu0 %v5187_v2  ;;  %3795 = vmatpush1.bf16.msra.mxu1 %v5190_v3  ;;  %v5249_v2 = vld [vmem:[#allocation8 + $0x2a4] ss:$16 sps:$4 sm:$0xff]   ;;  %v5252_v3 = vld [vmem:[#allocation8 + $0x2ac] ss:$16 sps:$4 sm:$0xff]  }
 0x1a0   :  { %3632 = vmatprep.subr.bf16.mxu0 %v5195_v4  ;;  %3796 = vmatprep.subr.bf16.mxu1 %v5198_v5  ;;  %v5247_v4 = vld [vmem:[#allocation8 + $0x2a0] ss:$16 sps:$4 sm:$0xff]   ;;  %v5250_v5 = vld [vmem:[#allocation8 + $0x2a8] ss:$16 sps:$4 sm:$0xff]  }
 0x1a3   :  { %3633 = vmatpush1.bf16.msra.mxu0 %v5193_v6  ;;  %3797 = vmatpush1.bf16.msra.mxu1 %v5196_v7  ;;  %v5255_v6 = vld [vmem:[#allocation8 + $0x2c4] ss:$16 sps:$4 sm:$0xff]   ;;  %v5258_v7 = vld [vmem:[#allocation8 + $0x2cc] ss:$16 sps:$4 sm:$0xff]  }
 0x1a4   :  { %3634 = vmatprep.subr.bf16.mxu0 %v5201_v8  ;;  %3798 = vmatprep.subr.bf16.mxu1 %v5204_v9  ;;  %v5253_v8 = vld [vmem:[#allocation8 + $0x2c0] ss:$16 sps:$4 sm:$0xff]   ;;  %v5256_v9 = vld [vmem:[#allocation8 + $0x2c8] ss:$16 sps:$4 sm:$0xff]  }
 0x1a7   :  { %3635 = vmatpush1.bf16.msra.mxu0 %v5199_v10  ;;  %3799 = vmatpush1.bf16.msra.mxu1 %v5202_v11  ;;  %v5261_v10 = vld [vmem:[#allocation8 + $0x2e4] ss:$16 sps:$4 sm:$0xff]   ;;  %v5264_v11 = vld [vmem:[#allocation8 + $0x2ec] ss:$16 sps:$4 sm:$0xff]  }
 0x1a8   :  { %3636 = vmatprep.subr.bf16.mxu0 %v5207_v13  ;;  %3800 = vmatprep.subr.bf16.mxu1 %v5210_v14  ;;  %v5259_v13 = vld [vmem:[#allocation8 + $0x2e0] ss:$16 sps:$4 sm:$0xff]   ;;  %v5262_v14 = vld [vmem:[#allocation8 + $0x2e8] ss:$16 sps:$4 sm:$0xff]  }
 0x1ab   :  { %3637 = vmatpush1.bf16.msra.mxu0 %v5205_v16  ;;  %3801 = vmatpush1.bf16.msra.mxu1 %v5208_v17  ;;  %v5267_v16 = vld [vmem:[#allocation8 + $0x304] ss:$16 sps:$4 sm:$0xff]   ;;  %v5270_v17 = vld [vmem:[#allocation8 + $0x30c] ss:$16 sps:$4 sm:$0xff]  }
 0x1ac   :  { %3638 = vmatprep.subr.bf16.mxu0 %v5213_v18  ;;  %3802 = vmatprep.subr.bf16.mxu1 %v5216_v19  ;;  %v5265_v18 = vld [vmem:[#allocation8 + $0x300] ss:$16 sps:$4 sm:$0xff]   ;;  %v5268_v19 = vld [vmem:[#allocation8 + $0x308] ss:$16 sps:$4 sm:$0xff]  }
 0x1af   :  { %3639 = vmatpush1.bf16.msra.mxu0 %v5211_v20  ;;  %3803 = vmatpush1.bf16.msra.mxu1 %v5214_v21  ;;  %v5273_v20 = vld [vmem:[#allocation8 + $0x324] ss:$16 sps:$4 sm:$0xff]   ;;  %v5276_v21 = vld [vmem:[#allocation8 + $0x32c] ss:$16 sps:$4 sm:$0xff]  }
 0x1b0   :  { %3649 = vmatprep.subr.bf16.mxu0 %v5219_v22  ;;  %3813 = vmatprep.subr.bf16.mxu1 %v5222_v23  ;;  %v5271_v22 = vld [vmem:[#allocation8 + $0x320] ss:$16 sps:$4 sm:$0xff]   ;;  %v5274_v23 = vld [vmem:[#allocation8 + $0x328] ss:$16 sps:$4 sm:$0xff]  }
 0x1c5   :  { %v1781_v15 = vpop.f32.mrb[0].mxu0  ;;  %v5898_v35 = vpop.f32.mrb[0].mxu1 }
 0x1c6   :  { %v5050_v34 = vadd.f32 %v1781_v15, %v375_v31  ;;  %v1783_v36 = vpop.f32.mrb[1].mxu0  ;;  %v1865_v37 = vpop.f32.mrb[1].mxu1  ;;  %v5282_v31 = vld [vmem:[#allocation8 + $0x34c] ss:$16 sps:$4 sm:$0xff]   ;;  %v5285_v15 = vld [vmem:[#allocation8 + $0x364] ss:$16 sps:$4 sm:$0xff]  }
 0x1c7   :  { %v5051_v24 = vadd.f32 %v1783_v36, %v379_v32  ;;  %v1785_v38 = vpop.f32.mrb[2].mxu0  ;;  %v5053_v40 = vadd.f32 %v1865_v37, %v387_v33  ;;  %v1867_v41 = vpop.f32.mrb[2].mxu1  ;;  %v5277_v32 = vld [vmem:[#allocation8 + $0x340] ss:$16 sps:$4 sm:$0xff]   ;;  %v5280_v33 = vld [vmem:[#allocation8 + $0x348] ss:$16 sps:$4 sm:$0xff]  }
 0x1c8   :  { %v2034_v39 = vmax.f32 %v5050_v34, 0.0  ;;  %v1786_v42 = vpop.f32.mrb[3].mxu0  ;;  %v1868_v44 = vpop.f32.mrb[3].mxu1  ;;  %v5288_v34 = vld [vmem:[#allocation8 + $0x36c] ss:$16 sps:$4 sm:$0xff]   ;;  %v382_v41 = vsub.s32 2, %v5882_v26 }
 0x1c9   :  { %v2035_v43 = vmax.f32 %v5051_v24, 0.0  ;;  %v2037_v45 = vmax.f32 %v5053_v40, 0.0  ;;  %v5283_v36 = vld [vmem:[#allocation8 + $0x360] ss:$16 sps:$4 sm:$0xff]   ;;  %v5286_v24 = vld [vmem:[#allocation8 + $0x368] ss:$16 sps:$4 sm:$0xff]  }
 0x1ca   :  { %v2042_v12 = vpack.c.bf16 %v2034_v39, %v2034_v39  ;;  %v5291_v37 = vld [vmem:[#allocation8 + $0x384] ss:$16 sps:$4 sm:$0xff]   ;;  %v5294_v38 = vld [vmem:[#allocation8 + $0x38c] ss:$16 sps:$4 sm:$0xff]   ;;  %v5289_v39 = vld [vmem:[#allocation8 + $0x380] ss:$16 sps:$4 sm:$0xff]  }
 0x1cb   :  { %v2043_v46 = vpack.c.bf16 %v2035_v43, %v2035_v43  ;;  %v2045_v51 = vpack.c.bf16 %v2037_v45, %v2037_v45  ;;  %v5292_v40 = vld [vmem:[#allocation8 + $0x388] ss:$16 sps:$4 sm:$0xff]   ;;  %v5297_v42 = vld [vmem:[#allocation8 + $0x3a4] ss:$16 sps:$4 sm:$0xff]   ;;  %v5300_v43 = vld [vmem:[#allocation8 + $0x3ac] ss:$16 sps:$4 sm:$0xff]  }
 0x1cc   :  { %v5295_v44 = vld [vmem:[#allocation8 + $0x3a0] ss:$16 sps:$4 sm:$0xff]   ;;  %v5298_v45 = vld [vmem:[#allocation8 + $0x3a8] ss:$16 sps:$4 sm:$0xff]  }
 0x1cd   :  { %3640 = vmatprep.mubr.bf16.mxu0 %v2043_v46  ;;  %3804 = vmatprep.mubr.bf16.mxu1 %v2043_v46  ;;  %v383_v46 = vrot.slane %v5885_v28, %v382_v41 }
 0x1ce   :  { %3641 = vmatmul.mubr.bf16.vlgmr.msra.gmra.mrb[8].mxu0 %v2042_v12  ;;  %3805 = vmatmul.mubr.bf16.vlgmr.msra.gmra.mrb[8].mxu1 %v2042_v12  ;;  %v5301_v12 = vld [vmem:[#allocation8 + $0x3c0] ss:$16 sps:$4 sm:$0xff]  }
 0x1cf   :  { %3650 = vmatpush1.bf16.msra.mxu0 %v5217_v47  ;;  %3814 = vmatpush1.bf16.msra.mxu1 %v5220_v48  ;;  %v5303_v47 = vld [vmem:[#allocation8 + $0x3c4] ss:$16 sps:$4 sm:$0xff]   ;;  %v5306_v48 = vld [vmem:[#allocation8 + $0x3cc] ss:$16 sps:$4 sm:$0xff]  }
 0x1d0   :  { %3681 = vmatprep.mubr.bf16.mxu0 %v2045_v51  ;;  %3845 = vmatprep.mubr.bf16.mxu1 %v2045_v51  ;;  %v5309_v51 = vld [vmem:[#allocation8 + $0x3e4] ss:$16 sps:$4 sm:$0xff]  }
 0x1d1   :  { %3651 = vmatprep.subr.bf16.mxu0 %v5225_v49  ;;  %3815 = vmatprep.subr.bf16.mxu1 %v5228_v50  ;;  %v5304_v49 = vld [vmem:[#allocation8 + $0x3c8] ss:$16 sps:$4 sm:$0xff]   ;;  %v5052_v50 = vadd.f32 %v5898_v35, %v383_v46  ;;  %v5321_v35 = vld [vmem:[#allocation8 + $0x424] ss:$16 sps:$4 sm:$0xff]   ;;  %v5379_v46 = vld [vmem:[#allocation8 + $0x560] ss:$16 sps:$4 sm:$0xff]  }
 0x1d3   :  { %3652 = vmatpush1.bf16.msra.mxu0 %v5223_v57  ;;  %3816 = vmatpush1.bf16.msra.mxu1 %v5226_v52  ;;  %v5312_v57 = vld [vmem:[#allocation8 + $0x3ec] ss:$16 sps:$4 sm:$0xff]   ;;  %v5307_v52 = vld [vmem:[#allocation8 + $0x3e0] ss:$16 sps:$4 sm:$0xff]  }
 0x1d4   :  { %3653 = vmatprep.subr.bf16.mxu0 %v5231_v54  ;;  %3817 = vmatprep.subr.bf16.mxu1 %v5234_v55  ;;  %v5310_v54 = vld [vmem:[#allocation8 + $0x3e8] ss:$16 sps:$4 sm:$0xff]   ;;  %v2036_v55 = vmax.f32 %v5052_v50, 0.0 }
 0x1d5   :  { %v5388_v50 = vld [vmem:[#allocation8 + $0x588] ss:$16 sps:$4 sm:$0xff]  }
 0x1d7   :  { %3654 = vmatpush1.bf16.msra.mxu0 %v5229_v56  ;;  %3818 = vmatpush1.bf16.msra.mxu1 %v5232_v53  ;;  %v5315_v56 = vld [vmem:[#allocation8 + $0x404] ss:$16 sps:$4 sm:$0xff]   ;;  %v5318_v53 = vld [vmem:[#allocation8 + $0x40c] ss:$16 sps:$4 sm:$0xff]  }
 0x1d8   :  { %3655 = vmatprep.subr.bf16.mxu0 %v5237_v58  ;;  %3819 = vmatprep.subr.bf16.mxu1 %v5240_v59  ;;  %v5313_v58 = vld [vmem:[#allocation8 + $0x400] ss:$16 sps:$4 sm:$0xff]   ;;  %v5316_v59 = vld [vmem:[#allocation8 + $0x408] ss:$16 sps:$4 sm:$0xff]  }
 0x1db   :  { %3656 = vmatpush1.bf16.msra.mxu0 %v5235_v60  ;;  %3820 = vmatpush1.bf16.msra.mxu1 %v5238_v61  ;;  %v2044_v60 = vpack.c.bf16 %v2036_v55, %v2036_v55  ;;  %v5324_v61 = vld [vmem:[#allocation8 + $0x42c] ss:$16 sps:$4 sm:$0xff]   ;;  %v5394_v55 = vld [vmem:[#allocation8 + $0x5a8] ss:$16 sps:$4 sm:$0xff]  }
 0x1dc   :  { %3657 = vmatprep.subr.bf16.mxu0 %v5243_v62  ;;  %3821 = vmatprep.subr.bf16.mxu1 %v5246_v63  ;;  %v5319_v62 = vld [vmem:[#allocation8 + $0x420] ss:$16 sps:$4 sm:$0xff]   ;;  %v5322_v63 = vld [vmem:[#allocation8 + $0x428] ss:$16 sps:$4 sm:$0xff]  }
 0x1df   :  { %3658 = vmatpush1.bf16.msra.mxu0 %v5241_v0  ;;  %3822 = vmatpush1.bf16.msra.mxu1 %v5244_v1  ;;  %v5327_v0 = vld [vmem:[#allocation8 + $0x444] ss:$16 sps:$4 sm:$0xff]   ;;  %v5330_v1 = vld [vmem:[#allocation8 + $0x44c] ss:$16 sps:$4 sm:$0xff]  }
 0x1e0   :  { %3659 = vmatprep.subr.bf16.mxu0 %v5249_v2  ;;  %3823 = vmatprep.subr.bf16.mxu1 %v5252_v3  ;;  %v5325_v2 = vld [vmem:[#allocation8 + $0x440] ss:$16 sps:$4 sm:$0xff]   ;;  %v5328_v3 = vld [vmem:[#allocation8 + $0x448] ss:$16 sps:$4 sm:$0xff]  }
 0x1e3   :  { %3660 = vmatpush1.bf16.msra.mxu0 %v5247_v4  ;;  %3824 = vmatpush1.bf16.msra.mxu1 %v5250_v5  ;;  %v5333_v4 = vld [vmem:[#allocation8 + $0x464] ss:$16 sps:$4 sm:$0xff]   ;;  %v5336_v5 = vld [vmem:[#allocation8 + $0x46c] ss:$16 sps:$4 sm:$0xff]  }
 0x1e4   :  { %3661 = vmatprep.subr.bf16.mxu0 %v5255_v6  ;;  %3825 = vmatprep.subr.bf16.mxu1 %v5258_v7  ;;  %v5331_v6 = vld [vmem:[#allocation8 + $0x460] ss:$16 sps:$4 sm:$0xff]   ;;  %v5334_v7 = vld [vmem:[#allocation8 + $0x468] ss:$16 sps:$4 sm:$0xff]  }
 0x1e7   :  { %3662 = vmatpush1.bf16.msra.mxu0 %v5253_v8  ;;  %3826 = vmatpush1.bf16.msra.mxu1 %v5256_v9  ;;  %v5339_v8 = vld [vmem:[#allocation8 + $0x484] ss:$16 sps:$4 sm:$0xff]   ;;  %v5342_v9 = vld [vmem:[#allocation8 + $0x48c] ss:$16 sps:$4 sm:$0xff]  }
 0x1e8   :  { %3663 = vmatprep.subr.bf16.mxu0 %v5261_v10  ;;  %3827 = vmatprep.subr.bf16.mxu1 %v5264_v11  ;;  %v5337_v10 = vld [vmem:[#allocation8 + $0x480] ss:$16 sps:$4 sm:$0xff]   ;;  %v5340_v11 = vld [vmem:[#allocation8 + $0x488] ss:$16 sps:$4 sm:$0xff]  }
 0x1eb   :  { %3664 = vmatpush1.bf16.msra.mxu0 %v5259_v13  ;;  %3828 = vmatpush1.bf16.msra.mxu1 %v5262_v14  ;;  %v5345_v13 = vld [vmem:[#allocation8 + $0x4a4] ss:$16 sps:$4 sm:$0xff]   ;;  %v5348_v14 = vld [vmem:[#allocation8 + $0x4ac] ss:$16 sps:$4 sm:$0xff]  }
 0x1ec   :  { %3665 = vmatprep.subr.bf16.mxu0 %v5267_v16  ;;  %3829 = vmatprep.subr.bf16.mxu1 %v5270_v17  ;;  %v5343_v16 = vld [vmem:[#allocation8 + $0x4a0] ss:$16 sps:$4 sm:$0xff]   ;;  %v5346_v17 = vld [vmem:[#allocation8 + $0x4a8] ss:$16 sps:$4 sm:$0xff]  }
 0x1ef   :  { %3666 = vmatpush1.bf16.msra.mxu0 %v5265_v18  ;;  %3830 = vmatpush1.bf16.msra.mxu1 %v5268_v19  ;;  %v5351_v18 = vld [vmem:[#allocation8 + $0x4c4] ss:$16 sps:$4 sm:$0xff]   ;;  %v5354_v19 = vld [vmem:[#allocation8 + $0x4cc] ss:$16 sps:$4 sm:$0xff]  }
 0x1f0   :  { %3667 = vmatprep.subr.bf16.mxu0 %v5273_v20  ;;  %3831 = vmatprep.subr.bf16.mxu1 %v5276_v21  ;;  %v5349_v20 = vld [vmem:[#allocation8 + $0x4c0] ss:$16 sps:$4 sm:$0xff]   ;;  %v5352_v21 = vld [vmem:[#allocation8 + $0x4c8] ss:$16 sps:$4 sm:$0xff]  }
 0x1f3   :  { %3668 = vmatpush1.bf16.msra.mxu0 %v5271_v22  ;;  %3832 = vmatpush1.bf16.msra.mxu1 %v5274_v23  ;;  %v5357_v22 = vld [vmem:[#allocation8 + $0x4e4] ss:$16 sps:$4 sm:$0xff]   ;;  %v5360_v23 = vld [vmem:[#allocation8 + $0x4ec] ss:$16 sps:$4 sm:$0xff]  }
 0x1f4   :  { %3669 = vmatprep.subr.bf16.mxu0 %v5279_v25  ;;  %3833 = vmatprep.subr.bf16.mxu1 %v5282_v31  ;;  %v5355_v25 = vld [vmem:[#allocation8 + $0x4e0] ss:$16 sps:$4 sm:$0xff]   ;;  %v5358_v31 = vld [vmem:[#allocation8 + $0x4e8] ss:$16 sps:$4 sm:$0xff]  }
 0x1f7   :  { %3670 = vmatpush1.bf16.msra.mxu0 %v5277_v32  ;;  %3834 = vmatpush1.bf16.msra.mxu1 %v5280_v33  ;;  %v5363_v32 = vld [vmem:[#allocation8 + $0x504] ss:$16 sps:$4 sm:$0xff]   ;;  %v5366_v33 = vld [vmem:[#allocation8 + $0x50c] ss:$16 sps:$4 sm:$0xff]  }
 0x1f8   :  { %3671 = vmatprep.subr.bf16.mxu0 %v5285_v15  ;;  %3835 = vmatprep.subr.bf16.mxu1 %v5288_v34  ;;  %v5361_v15 = vld [vmem:[#allocation8 + $0x500] ss:$16 sps:$4 sm:$0xff]   ;;  %v5364_v34 = vld [vmem:[#allocation8 + $0x508] ss:$16 sps:$4 sm:$0xff]  }
 0x1fb   :  { %3672 = vmatpush1.bf16.msra.mxu0 %v5283_v36  ;;  %3836 = vmatpush1.bf16.msra.mxu1 %v5286_v24  ;;  %v5369_v36 = vld [vmem:[#allocation8 + $0x524] ss:$16 sps:$4 sm:$0xff]   ;;  %v5372_v24 = vld [vmem:[#allocation8 + $0x52c] ss:$16 sps:$4 sm:$0xff]  }
 0x1fc   :  { %3673 = vmatprep.subr.bf16.mxu0 %v5291_v37  ;;  %3837 = vmatprep.subr.bf16.mxu1 %v5294_v38  ;;  %v5367_v37 = vld [vmem:[#allocation8 + $0x520] ss:$16 sps:$4 sm:$0xff]   ;;  %v5370_v38 = vld [vmem:[#allocation8 + $0x528] ss:$16 sps:$4 sm:$0xff]  }
 0x1ff   :  { %3674 = vmatpush1.bf16.msra.mxu0 %v5289_v39  ;;  %3838 = vmatpush1.bf16.msra.mxu1 %v5292_v40  ;;  %v5375_v39 = vld [vmem:[#allocation8 + $0x544] ss:$16 sps:$4 sm:$0xff]   ;;  %v5378_v40 = vld [vmem:[#allocation8 + $0x54c] ss:$16 sps:$4 sm:$0xff]  }
 0x200   :  { %3675 = vmatprep.subr.bf16.mxu0 %v5297_v42  ;;  %3839 = vmatprep.subr.bf16.mxu1 %v5300_v43  ;;  %v5373_v42 = vld [vmem:[#allocation8 + $0x540] ss:$16 sps:$4 sm:$0xff]   ;;  %v5376_v43 = vld [vmem:[#allocation8 + $0x548] ss:$16 sps:$4 sm:$0xff]  }
 0x203   :  { %3676 = vmatpush1.bf16.msra.mxu0 %v5295_v44  ;;  %3840 = vmatpush1.bf16.msra.mxu1 %v5298_v45  ;;  %v5381_v44 = vld [vmem:[#allocation8 + $0x564] ss:$16 sps:$4 sm:$0xff]   ;;  %v5384_v45 = vld [vmem:[#allocation8 + $0x56c] ss:$16 sps:$4 sm:$0xff]  }
 0x204   :  { %3677 = vmatprep.subr.bf16.mxu0 %v5303_v47  ;;  %3841 = vmatprep.subr.bf16.mxu1 %v5306_v48  ;;  %v5382_v47 = vld [vmem:[#allocation8 + $0x568] ss:$16 sps:$4 sm:$0xff]   ;;  %v5387_v48 = vld [vmem:[#allocation8 + $0x584] ss:$16 sps:$4 sm:$0xff]  }
 0x207   :  { %3678 = vmatpush1.bf16.msra.mxu0 %v5301_v12  ;;  %3842 = vmatpush1.bf16.msra.mxu1 %v5304_v49  ;;  %v5390_v12 = vld [vmem:[#allocation8 + $0x58c] ss:$16 sps:$4 sm:$0xff]   ;;  %v5385_v49 = vld [vmem:[#allocation8 + $0x580] ss:$16 sps:$4 sm:$0xff]  }
 0x208   :  { %3679 = vmatprep.subr.bf16.mxu0 %v5309_v51  ;;  %3843 = vmatprep.subr.bf16.mxu1 %v5312_v57  ;;  %v5393_v51 = vld [vmem:[#allocation8 + $0x5a4] ss:$16 sps:$4 sm:$0xff]   ;;  %v5396_v57 = vld [vmem:[#allocation8 + $0x5ac] ss:$16 sps:$4 sm:$0xff]  }
 0x20b   :  { %3680 = vmatpush1.bf16.msra.mxu0 %v5307_v52  ;;  %3844 = vmatpush1.bf16.msra.mxu1 %v5310_v54  ;;  %v390_v52 = vsub.s32 4, %v5882_v26  ;;  %v5391_v54 = vld [vmem:[#allocation8 + $0x5a0] ss:$16 sps:$4 sm:$0xff]  }
 0x20c   :  { %3690 = vmatprep.subr.bf16.mxu0 %v5315_v56  ;;  %3854 = vmatprep.subr.bf16.mxu1 %v5318_v53  ;;  %v394_v56 = vsub.s32 5, %v5882_v26  ;;  %v5399_v53 = vld [vmem:[#allocation8 + $0x5c4] ss:$16 sps:$4 sm:$0xff]  }
 0x20e   :  { %3682 = vmatmul.mubr.bf16.vlgmr.msra.gmra.mrb[8].mxu0 %v2044_v60  ;;  %3846 = vmatmul.mubr.bf16.vlgmr.msra.gmra.mrb[8].mxu1 %v2044_v60  ;;  %v391_v60 = vrot.slane %v5885_v28, %v390_v52  ;;  %v5450_v52 = vld [vmem:[#allocation8 + $0x6cc] ss:$16 sps:$4 sm:$0xff]  }
 0x20f   :  { %3691 = vmatpush1.bf16.msra.mxu0 %v5313_v58  ;;  %3855 = vmatpush1.bf16.msra.mxu1 %v5316_v59  ;;  %v5402_v58 = vld [vmem:[#allocation8 + $0x5cc] ss:$16 sps:$4 sm:$0xff]   ;;  %v402_v59 = vsub.s32 7, %v5882_v26 }
 0x210   :  { %3692 = vmatprep.subr.bf16.mxu0 %v5321_v35  ;;  %3856 = vmatprep.subr.bf16.mxu1 %v5324_v61  ;;  %v5397_v35 = vld [vmem:[#allocation8 + $0x5c0] ss:$16 sps:$4 sm:$0xff]   ;;  %v5400_v61 = vld [vmem:[#allocation8 + $0x5c8] ss:$16 sps:$4 sm:$0xff]  }
 0x213   :  { %3693 = vmatpush1.bf16.msra.mxu0 %v5319_v62  ;;  %3857 = vmatpush1.bf16.msra.mxu1 %v5322_v63  ;;  %v395_v62 = vrot.slane %v5885_v28, %v394_v56  ;;  %v403_v63 = vrot.slane %v5885_v28, %v402_v59  ;;  %v5453_v56 = vld [vmem:[#allocation8 + $0x6e4] ss:$16 sps:$4 sm:$0xff]   ;;  %v5454_v59 = vld [vmem:[#allocation8 + $0x6e8] ss:$16 sps:$4 sm:$0xff]  }
 0x214   :  { %3694 = vmatprep.subr.bf16.mxu0 %v5327_v0  ;;  %3858 = vmatprep.subr.bf16.mxu1 %v5330_v1  ;;  %v5405_v0 = vld [vmem:[#allocation8 + $0x5e4] ss:$16 sps:$4 sm:$0xff]   ;;  %v5408_v1 = vld [vmem:[#allocation8 + $0x5ec] ss:$16 sps:$4 sm:$0xff]  }
 0x217   :  { %3695 = vmatpush1.bf16.msra.mxu0 %v5325_v2  ;;  %3859 = vmatpush1.bf16.msra.mxu1 %v5328_v3 }
 0x218   :  { %3696 = vmatprep.subr.bf16.mxu0 %v5333_v4  ;;  %3860 = vmatprep.subr.bf16.mxu1 %v5336_v5 }
 0x21b   :  { %3697 = vmatpush1.bf16.msra.mxu0 %v5331_v6  ;;  %3861 = vmatpush1.bf16.msra.mxu1 %v5334_v7  ;;  %v5403_v6 = vld [vmem:[#allocation8 + $0x5e0] ss:$16 sps:$4 sm:$0xff]  }
 0x21c   :  { %3698 = vmatprep.subr.bf16.mxu0 %v5339_v8  ;;  %3862 = vmatprep.subr.bf16.mxu1 %v5342_v9 }
 0x21f   :  { %3699 = vmatpush1.bf16.msra.mxu0 %v5337_v10  ;;  %3863 = vmatpush1.bf16.msra.mxu1 %v5340_v11  ;;  %v5406_v10 = vld [vmem:[#allocation8 + $0x5e8] ss:$16 sps:$4 sm:$0xff]   ;;  %v5411_v11 = vld [vmem:[#allocation8 + $0x604] ss:$16 sps:$4 sm:$0xff]  }
 0x220   :  { %3700 = vmatprep.subr.bf16.mxu0 %v5345_v13  ;;  %3864 = vmatprep.subr.bf16.mxu1 %v5348_v14 }
 0x223   :  { %3701 = vmatpush1.bf16.msra.mxu0 %v5343_v16  ;;  %3865 = vmatpush1.bf16.msra.mxu1 %v5346_v17 }
 0x224   :  { %3702 = vmatprep.subr.bf16.mxu0 %v5351_v18  ;;  %3866 = vmatprep.subr.bf16.mxu1 %v5354_v19  ;;  %v5414_v18 = vld [vmem:[#allocation8 + $0x60c] ss:$16 sps:$4 sm:$0xff]  }
 0x227   :  { %3703 = vmatpush1.bf16.msra.mxu0 %v5349_v20  ;;  %3867 = vmatpush1.bf16.msra.mxu1 %v5352_v21 }
 0x228   :  { %3704 = vmatprep.subr.bf16.mxu0 %v5357_v22  ;;  %3868 = vmatprep.subr.bf16.mxu1 %v5360_v23  ;;  %v5409_v23 = vld [vmem:[#allocation8 + $0x600] ss:$16 sps:$4 sm:$0xff]  }
 0x22b   :  { %3705 = vmatpush1.bf16.msra.mxu0 %v5355_v25  ;;  %3869 = vmatpush1.bf16.msra.mxu1 %v5358_v31  ;;  %v5412_v25 = vld [vmem:[#allocation8 + $0x608] ss:$16 sps:$4 sm:$0xff]  }
 0x22c   :  { %3706 = vmatprep.subr.bf16.mxu0 %v5363_v32  ;;  %3870 = vmatprep.subr.bf16.mxu1 %v5366_v33  ;;  %v5417_v32 = vld [vmem:[#allocation8 + $0x624] ss:$16 sps:$4 sm:$0xff]   ;;  %v5420_v33 = vld [vmem:[#allocation8 + $0x62c] ss:$16 sps:$4 sm:$0xff]  }
 0x22f   :  { %3707 = vmatpush1.bf16.msra.mxu0 %v5361_v15  ;;  %3871 = vmatpush1.bf16.msra.mxu1 %v5364_v34  ;;  %v5415_v34 = vld [vmem:[#allocation8 + $0x620] ss:$16 sps:$4 sm:$0xff]  }
 0x230   :  { %3708 = vmatprep.subr.bf16.mxu0 %v5369_v36  ;;  %3872 = vmatprep.subr.bf16.mxu1 %v5372_v24  ;;  %v5418_v36 = vld [vmem:[#allocation8 + $0x628] ss:$16 sps:$4 sm:$0xff]   ;;  %v5423_v24 = vld [vmem:[#allocation8 + $0x644] ss:$16 sps:$4 sm:$0xff]  }
 0x233   :  { %3709 = vmatpush1.bf16.msra.mxu0 %v5367_v37  ;;  %3873 = vmatpush1.bf16.msra.mxu1 %v5370_v38  ;;  %v5426_v37 = vld [vmem:[#allocation8 + $0x64c] ss:$16 sps:$4 sm:$0xff]   ;;  %v5421_v38 = vld [vmem:[#allocation8 + $0x640] ss:$16 sps:$4 sm:$0xff]  }
 0x234   :  { %3710 = vmatprep.subr.bf16.mxu0 %v5375_v39  ;;  %3874 = vmatprep.subr.bf16.mxu1 %v5378_v40  ;;  %v5424_v39 = vld [vmem:[#allocation8 + $0x648] ss:$16 sps:$4 sm:$0xff]   ;;  %v5429_v40 = vld [vmem:[#allocation8 + $0x664] ss:$16 sps:$4 sm:$0xff]  }
 0x237   :  { %3711 = vmatpush1.bf16.msra.mxu0 %v5373_v42  ;;  %3875 = vmatpush1.bf16.msra.mxu1 %v5376_v43  ;;  %v5432_v42 = vld [vmem:[#allocation8 + $0x66c] ss:$16 sps:$4 sm:$0xff]   ;;  %v5427_v43 = vld [vmem:[#allocation8 + $0x660] ss:$16 sps:$4 sm:$0xff]  }
 0x238   :  { %3712 = vmatprep.subr.bf16.mxu0 %v5381_v44  ;;  %3876 = vmatprep.subr.bf16.mxu1 %v5384_v45  ;;  %v5430_v44 = vld [vmem:[#allocation8 + $0x668] ss:$16 sps:$4 sm:$0xff]   ;;  %v5435_v45 = vld [vmem:[#allocation8 + $0x684] ss:$16 sps:$4 sm:$0xff]  }
 0x23b   :  { %3713 = vmatpush1.bf16.msra.mxu0 %v5379_v46  ;;  %3877 = vmatpush1.bf16.msra.mxu1 %v5382_v47  ;;  %v5438_v46 = vld [vmem:[#allocation8 + $0x68c] ss:$16 sps:$4 sm:$0xff]   ;;  %v5433_v47 = vld [vmem:[#allocation8 + $0x680] ss:$16 sps:$4 sm:$0xff]  }
 0x23c   :  { %3714 = vmatprep.subr.bf16.mxu0 %v5387_v48  ;;  %3878 = vmatprep.subr.bf16.mxu1 %v5390_v12  ;;  %v5436_v48 = vld [vmem:[#allocation8 + $0x688] ss:$16 sps:$4 sm:$0xff]   ;;  %v5441_v12 = vld [vmem:[#allocation8 + $0x6a4] ss:$16 sps:$4 sm:$0xff]  }
 0x23f   :  { %3715 = vmatpush1.bf16.msra.mxu0 %v5385_v49  ;;  %3879 = vmatpush1.bf16.msra.mxu1 %v5388_v50  ;;  %v5444_v49 = vld [vmem:[#allocation8 + $0x6ac] ss:$16 sps:$4 sm:$0xff]   ;;  %v5439_v50 = vld [vmem:[#allocation8 + $0x6a0] ss:$16 sps:$4 sm:$0xff]  }
 0x240   :  { %3716 = vmatprep.subr.bf16.mxu0 %v5393_v51  ;;  %3880 = vmatprep.subr.bf16.mxu1 %v5396_v57  ;;  %v5442_v51 = vld [vmem:[#allocation8 + $0x6a8] ss:$16 sps:$4 sm:$0xff]   ;;  %v5447_v57 = vld [vmem:[#allocation8 + $0x6c4] ss:$16 sps:$4 sm:$0xff]  }
 0x243   :  { %3717 = vmatpush1.bf16.msra.mxu0 %v5391_v54  ;;  %3881 = vmatpush1.bf16.msra.mxu1 %v5394_v55  ;;  %v5445_v54 = vld [vmem:[#allocation8 + $0x6c0] ss:$16 sps:$4 sm:$0xff]   ;;  %v5448_v55 = vld [vmem:[#allocation8 + $0x6c8] ss:$16 sps:$4 sm:$0xff]  }
 0x244   :  { %3718 = vmatprep.subr.bf16.mxu0 %v5399_v53  ;;  %3882 = vmatprep.subr.bf16.mxu1 %v5402_v58  ;;  %v5456_v53 = vld [vmem:[#allocation8 + $0x6ec] ss:$16 sps:$4 sm:$0xff]   ;;  %v5451_v58 = vld [vmem:[#allocation8 + $0x6e0] ss:$16 sps:$4 sm:$0xff]  }
 0x245   :  { %v1945_v2 = vpop.f32.mrb[4].mxu0  ;;  %v5911_v4 = vpop.f32.mrb[4].mxu1 }
 0x246   :  { %v5054_v3 = vadd.f32 %v1945_v2, %v391_v60  ;;  %v1947_v5 = vpop.f32.mrb[5].mxu0  ;;  %v2029_v8 = vpop.f32.mrb[5].mxu1  ;;  %v5459_v60 = vld [vmem:[#allocation8 + $0x704] ss:$16 sps:$4 sm:$0xff]   ;;  %v5466_v2 = vld [vmem:[#allocation8 + $0x728] ss:$16 sps:$4 sm:$0xff]  }
 0x247   :  { %v5055_v7 = vadd.f32 %v1947_v5, %v395_v62  ;;  %3719 = vmatpush1.bf16.msra.mxu0 %v5397_v35  ;;  %3883 = vmatpush1.bf16.msra.mxu1 %v5400_v61  ;;  %v1949_v9 = vpop.f32.mrb[6].mxu0  ;;  %v5057_v14 = vadd.f32 %v2029_v8, %v403_v63  ;;  %v2031_v16 = vpop.f32.mrb[6].mxu1  ;;  %v5462_v35 = vld [vmem:[#allocation8 + $0x70c] ss:$16 sps:$4 sm:$0xff]   ;;  %v5457_v61 = vld [vmem:[#allocation8 + $0x700] ss:$16 sps:$4 sm:$0xff]  }
 0x248   :  { %v2038_v13 = vmax.f32 %v5054_v3, 0.0  ;;  %v1950_v17 = vpop.f32.mrb[7].mxu0  ;;  %3720 = vmatprep.subr.bf16.mxu0 %v5405_v0  ;;  %3884 = vmatprep.subr.bf16.mxu1 %v5408_v1  ;;  %v2032_v20 = vpop.f32.mrb[7].mxu1  ;;  %v5460_v62 = vld [vmem:[#allocation8 + $0x708] ss:$16 sps:$4 sm:$0xff]  }
 0x249   :  { %v2039_v19 = vmax.f32 %v5055_v7, 0.0  ;;  %v2041_v21 = vmax.f32 %v5057_v14, 0.0  ;;  %v5465_v63 = vld [vmem:[#allocation8 + $0x724] ss:$16 sps:$4 sm:$0xff]   ;;  %v5468_v0 = vld [vmem:[#allocation8 + $0x72c] ss:$16 sps:$4 sm:$0xff]  }
 0x24a   :  { %v2046_v31 = vpack.c.bf16 %v2038_v13, %v2038_v13  ;;  %v5463_v1 = vld [vmem:[#allocation8 + $0x720] ss:$16 sps:$4 sm:$0xff]   ;;  %v5471_v3 = vld [vmem:[#allocation8 + $0x744] ss:$16 sps:$4 sm:$0xff]   ;;  %v5474_v5 = vld [vmem:[#allocation8 + $0x74c] ss:$16 sps:$4 sm:$0xff]  }
 0x24b   :  { %v2047_v22 = vpack.c.bf16 %v2039_v19, %v2039_v19  ;;  %3721 = vmatpush1.bf16.msra.mxu0 %v5403_v6  ;;  %3885 = vmatpush1.bf16.msra.mxu1 %v5406_v10  ;;  %v2049_v15 = vpack.c.bf16 %v2041_v21, %v2041_v21  ;;  %v5469_v6 = vld [vmem:[#allocation8 + $0x740] ss:$16 sps:$4 sm:$0xff]   ;;  %v5472_v7 = vld [vmem:[#allocation8 + $0x748] ss:$16 sps:$4 sm:$0xff]   ;;  %v5477_v8 = vld [vmem:[#allocation8 + $0x764] ss:$16 sps:$4 sm:$0xff]  }
 0x24c   :  { %3731 = vmatprep.subr.bf16.mxu0 %v5411_v11  ;;  %3895 = vmatprep.subr.bf16.mxu1 %v5414_v18  ;;  %v5480_v9 = vld [vmem:[#allocation8 + $0x76c] ss:$16 sps:$4 sm:$0xff]   ;;  %v5475_v10 = vld [vmem:[#allocation8 + $0x760] ss:$16 sps:$4 sm:$0xff]   ;;  %v5478_v11 = vld [vmem:[#allocation8 + $0x768] ss:$16 sps:$4 sm:$0xff]  }
 0x24d   :  { %3722 = vmatprep.mubr.bf16.mxu0 %v2047_v22  ;;  %3886 = vmatprep.mubr.bf16.mxu1 %v2047_v22  ;;  %v5483_v13 = vld [vmem:[#allocation8 + $0x784] ss:$16 sps:$4 sm:$0xff]   ;;  %v5486_v14 = vld [vmem:[#allocation8 + $0x78c] ss:$16 sps:$4 sm:$0xff]   ;;  %v5481_v16 = vld [vmem:[#allocation8 + $0x780] ss:$16 sps:$4 sm:$0xff]  }
 0x24e   :  { %3723 = vmatmul.mubr.bf16.vlgmr.msra.gmra.mrb[8].mxu0 %v2046_v31  ;;  %3887 = vmatmul.mubr.bf16.vlgmr.msra.gmra.mrb[8].mxu1 %v2046_v31  ;;  %v5484_v17 = vld [vmem:[#allocation8 + $0x788] ss:$16 sps:$4 sm:$0xff]   ;;  %v398_v18 = vsub.s32 6, %v5882_v26  ;;  %v5489_v19 = vld [vmem:[#allocation8 + $0x7a4] ss:$16 sps:$4 sm:$0xff]  }
 0x24f   :  { %3732 = vmatpush1.bf16.msra.mxu0 %v5409_v23  ;;  %3896 = vmatpush1.bf16.msra.mxu1 %v5412_v25  ;;  %v5492_v20 = vld [vmem:[#allocation8 + $0x7ac] ss:$16 sps:$4 sm:$0xff]   ;;  %v5487_v21 = vld [vmem:[#allocation8 + $0x7a0] ss:$16 sps:$4 sm:$0xff]   ;;  %v5490_v22 = vld [vmem:[#allocation8 + $0x7a8] ss:$16 sps:$4 sm:$0xff]  }
 0x250   :  { %3763 = vmatprep.mubr.bf16.mxu0 %v2049_v15  ;;  %3927 = vmatprep.mubr.bf16.mxu1 %v2049_v15  ;;  %v399_v23 = vrot.slane %v5885_v28, %v398_v18  ;;  %v5495_v25 = vld [vmem:[#allocation8 + $0x7c4] ss:$16 sps:$4 sm:$0xff]   ;;  %v5498_v31 = vld [vmem:[#allocation8 + $0x7cc] ss:$16 sps:$4 sm:$0xff]  }
 0x251   :  { %3733 = vmatprep.subr.bf16.mxu0 %v5417_v32  ;;  %3897 = vmatprep.subr.bf16.mxu1 %v5420_v33  ;;  %v5493_v32 = vld [vmem:[#allocation8 + $0x7c0] ss:$16 sps:$4 sm:$0xff]   ;;  %v5496_v33 = vld [vmem:[#allocation8 + $0x7c8] ss:$16 sps:$4 sm:$0xff]  }
 0x252   :  { %v5056_v15 = vadd.f32 %v5911_v4, %v399_v23  ;;  %v5505_v28 = vld [vmem:[#allocation10 + $0x40] sm:$0xff]   ;;  %v5509_v4 = vld [vmem:[#allocation10 + $0x48] sm:$0xff]  }
 0x253   :  { %3734 = vmatpush1.bf16.msra.mxu0 %v5415_v34  ;;  %3898 = vmatpush1.bf16.msra.mxu1 %v5418_v36  ;;  %v5501_v34 = vld [vmem:[#allocation8 + $0x7e4] ss:$16 sps:$4 sm:$0xff]   ;;  %v5504_v36 = vld [vmem:[#allocation8 + $0x7ec] ss:$16 sps:$4 sm:$0xff]  }
 0x254   :  { %3735 = vmatprep.subr.bf16.mxu0 %v5423_v24  ;;  %3899 = vmatprep.subr.bf16.mxu1 %v5426_v37  ;;  %v5499_v24 = vld [vmem:[#allocation8 + $0x7e0] ss:$16 sps:$4 sm:$0xff]   ;;  %v5502_v37 = vld [vmem:[#allocation8 + $0x7e8] ss:$16 sps:$4 sm:$0xff]  }
 0x255   :  { %v5537_v26 = vld [vmem:[#allocation11] sm:$0xff]  }
 0x257   :  { %3736 = vmatpush1.bf16.msra.mxu0 %v5421_v38  ;;  %3900 = vmatpush1.bf16.msra.mxu1 %v5424_v39  ;;  %v2040_v38 = vmax.f32 %v5056_v15, 0.0  ;;  %v5506_v39 = vld [vmem:[#allocation10 + $0xc0] sm:$0xff]  }
 0x258   :  { %3737 = vmatprep.subr.bf16.mxu0 %v5429_v40  ;;  %3901 = vmatprep.subr.bf16.mxu1 %v5432_v42  ;;  %v5507_v40 = vld [vmem:[#allocation10] sm:$0xff]  }
 0x259   :  { %v5508_v42 = vld [vmem:[#allocation10 + $0x80] sm:$0xff]  }
 0x25b   :  { %3738 = vmatpush1.bf16.msra.mxu0 %v5427_v43  ;;  %3902 = vmatpush1.bf16.msra.mxu1 %v5430_v44  ;;  %v2048_v43 = vpack.c.bf16 %v2040_v38, %v2040_v38  ;;  %v5510_v44 = vld [vmem:[#allocation10 + $0xc8] sm:$0xff]   ;;  %v5541_v38 = vld [vmem:[#allocation11 + $0x20] sm:$0xff]  }
 0x25c   :  { %3739 = vmatprep.subr.bf16.mxu0 %v5435_v45  ;;  %3903 = vmatprep.subr.bf16.mxu1 %v5438_v46  ;;  %v5511_v45 = vld [vmem:[#allocation10 + $0x8] sm:$0xff]  }
 0x25d   :  { %v5512_v46 = vld [vmem:[#allocation10 + $0x88] sm:$0xff]  }
 0x25f   :  { %3740 = vmatpush1.bf16.msra.mxu0 %v5433_v47  ;;  %3904 = vmatpush1.bf16.msra.mxu1 %v5436_v48  ;;  %v5513_v47 = vld [vmem:[#allocation10 + $0x50] sm:$0xff]  }
 0x260   :  { %3741 = vmatprep.subr.bf16.mxu0 %v5441_v12  ;;  %3905 = vmatprep.subr.bf16.mxu1 %v5444_v49  ;;  %v5514_v48 = vld [vmem:[#allocation10 + $0xd0] sm:$0xff]  }
 0x261   :  { %v5515_v12 = vld [vmem:[#allocation10 + $0x10] sm:$0xff]  }
 0x262   :  { %v5516_v49 = vld [vmem:[#allocation10 + $0x90] sm:$0xff]  }
 0x263   :  { %3742 = vmatpush1.bf16.msra.mxu0 %v5439_v50  ;;  %3906 = vmatpush1.bf16.msra.mxu1 %v5442_v51  ;;  %v5517_v50 = vld [vmem:[#allocation10 + $0x58] sm:$0xff]  }
 0x264   :  { %3743 = vmatprep.subr.bf16.mxu0 %v5447_v57  ;;  %3907 = vmatprep.subr.bf16.mxu1 %v5450_v52  ;;  %v5518_v51 = vld [vmem:[#allocation10 + $0xd8] sm:$0xff]  }
 0x265   :  { %v5519_v57 = vld [vmem:[#allocation10 + $0x18] sm:$0xff]  }
 0x266   :  { %v5520_v52 = vld [vmem:[#allocation10 + $0x98] sm:$0xff]  }
 0x267   :  { %3744 = vmatpush1.bf16.msra.mxu0 %v5445_v54  ;;  %3908 = vmatpush1.bf16.msra.mxu1 %v5448_v55  ;;  %v5521_v54 = vld [vmem:[#allocation10 + $0x60] sm:$0xff]  }
 0x268   :  { %3745 = vmatprep.subr.bf16.mxu0 %v5453_v56  ;;  %3909 = vmatprep.subr.bf16.mxu1 %v5456_v53  ;;  %v5522_v55 = vld [vmem:[#allocation10 + $0xe0] sm:$0xff]  }
 0x269   :  { %v5523_v56 = vld [vmem:[#allocation10 + $0x20] sm:$0xff]  }
 0x26a   :  { %v5524_v53 = vld [vmem:[#allocation10 + $0xa0] sm:$0xff]  }
 0x26b   :  { %3746 = vmatpush1.bf16.msra.mxu0 %v5451_v58  ;;  %3910 = vmatpush1.bf16.msra.mxu1 %v5454_v59  ;;  %v5525_v58 = vld [vmem:[#allocation10 + $0x68] sm:$0xff]  }
 0x26c   :  { %3747 = vmatprep.subr.bf16.mxu0 %v5459_v60  ;;  %3911 = vmatprep.subr.bf16.mxu1 %v5462_v35  ;;  %v5526_v59 = vld [vmem:[#allocation10 + $0xe8] sm:$0xff]  }
 0x26d   :  { %v5527_v60 = vld [vmem:[#allocation10 + $0x28] sm:$0xff]  }
 0x26e   :  { %v5528_v35 = vld [vmem:[#allocation10 + $0xa8] sm:$0xff]  }
 0x26f   :  { %3748 = vmatpush1.bf16.msra.mxu0 %v5457_v61  ;;  %3912 = vmatpush1.bf16.msra.mxu1 %v5460_v62  ;;  %v5529_v61 = vld [vmem:[#allocation10 + $0x70] sm:$0xff]  }
 0x270   :  { %3749 = vmatprep.subr.bf16.mxu0 %v5465_v63  ;;  %3913 = vmatprep.subr.bf16.mxu1 %v5468_v0  ;;  %v5530_v62 = vld [vmem:[#allocation10 + $0xf0] sm:$0xff]  }
 0x271   :  { %v5531_v63 = vld [vmem:[#allocation10 + $0x30] sm:$0xff]  }
 0x272   :  { %v5532_v0 = vld [vmem:[#allocation10 + $0xb0] sm:$0xff]  }
 0x273   :  { %3750 = vmatpush1.bf16.msra.mxu0 %v5463_v1  ;;  %3914 = vmatpush1.bf16.msra.mxu1 %v5466_v2  ;;  %v5533_v1 = vld [vmem:[#allocation10 + $0x78] sm:$0xff]  }
 0x274   :  { %3751 = vmatprep.subr.bf16.mxu0 %v5471_v3  ;;  %3915 = vmatprep.subr.bf16.mxu1 %v5474_v5  ;;  %v5534_v2 = vld [vmem:[#allocation10 + $0xf8] sm:$0xff]  }
 0x275   :  { %v5535_v3 = vld [vmem:[#allocation10 + $0x38] sm:$0xff]  }
 0x276   :  { %v5536_v5 = vld [vmem:[#allocation10 + $0xb8] sm:$0xff]  }
 0x277   :  { %3752 = vmatpush1.bf16.msra.mxu0 %v5469_v6  ;;  %3916 = vmatpush1.bf16.msra.mxu1 %v5472_v7  ;;  %v5721_v6 = vmov 0.0   ;;  %v2306_v7 = vld [vmem:[%s5949_s4] sm:$0xf] }
 0x278   :  { %3753 = vmatprep.subr.bf16.mxu0 %v5477_v8  ;;  %3917 = vmatprep.subr.bf16.mxu1 %v5480_v9  ;;  %v2311_v8 = vrot.slane %v2306_v7, %v374_v27  ;;  %v2319_v9 = vrot.slane %v2306_v7, %v382_v41 }
 0x27b   :  { %3754 = vmatpush1.bf16.msra.mxu0 %v5475_v10  ;;  %3918 = vmatpush1.bf16.msra.mxu1 %v5478_v11  ;;  %v2315_v10 = vrot.slane %v2306_v7, %v378_v29  ;;  %v2323_v11 = vrot.slane %v2306_v7, %v386_v30 }
 0x27c   :  { %3755 = vmatprep.subr.bf16.mxu0 %v5483_v13  ;;  %3919 = vmatprep.subr.bf16.mxu1 %v5486_v14 }
 0x27f   :  { %3756 = vmatpush1.bf16.msra.mxu0 %v5481_v16  ;;  %3920 = vmatpush1.bf16.msra.mxu1 %v5484_v17 }
 0x280   :  { %3757 = vmatprep.subr.bf16.mxu0 %v5489_v19  ;;  %3921 = vmatprep.subr.bf16.mxu1 %v5492_v20 }
 0x283   :  { %3758 = vmatpush1.bf16.msra.mxu0 %v5487_v21  ;;  %3922 = vmatpush1.bf16.msra.mxu1 %v5490_v22 }
 0x284   :  { %3759 = vmatprep.subr.bf16.mxu0 %v5495_v25  ;;  %3923 = vmatprep.subr.bf16.mxu1 %v5498_v31 }
 0x287   :  { %3760 = vmatpush1.bf16.msra.mxu0 %v5493_v32  ;;  %3924 = vmatpush1.bf16.msra.mxu1 %v5496_v33 }
 0x288   :  { %3761 = vmatprep.subr.bf16.mxu0 %v5501_v34  ;;  %3925 = vmatprep.subr.bf16.mxu1 %v5504_v36  ;;  %v5538_v36 = vld [vmem:[#allocation11 + $0x8] sm:$0xff]  }
 0x28b   :  { %3762 = vmatpush1.bf16.msra.mxu0 %v5499_v24  ;;  %3926 = vmatpush1.bf16.msra.mxu1 %v5502_v37  ;;  %v5539_v24 = vld [vmem:[#allocation11 + $0x10] sm:$0xff]   ;;  %v5540_v37 = vld [vmem:[#allocation11 + $0x18] sm:$0xff]  }
 0x28c   :  { %4977 = vmatprep.subr.bf16.mxu0 %v5505_v28  ;;  %4999 = vmatprep.subr.bf16.mxu1 %v5506_v39  ;;  %v5542_v28 = vld [vmem:[#allocation11 + $0x28] sm:$0xff]   ;;  %v5543_v39 = vld [vmem:[#allocation11 + $0x30] sm:$0xff]  }
 0x28e   :  { %3764 = vmatmul.mubr.bf16.vlgmr.msra.gmra.mrb[8].mxu0 %v2048_v43  ;;  %3928 = vmatmul.mubr.bf16.vlgmr.msra.gmra.mrb[8].mxu1 %v2048_v43 }
 0x28f   :  { %4978 = vmatpush3.bf16.msra.mxu0 %v5507_v40  ;;  %5000 = vmatpush3.bf16.msra.mxu1 %v5508_v42  ;;  %v5544_v40 = vld [vmem:[#allocation11 + $0x38] sm:$0xff]  }
 0x290   :  { %4979 = vmatprep.subr.bf16.mxu0 %v5509_v4  ;;  %5001 = vmatprep.subr.bf16.mxu1 %v5510_v44  ;;  %v4935_v4 = vld [vmem:[%s5951_s6] ss:$0 sm:$0xff]  ;;  %s5677_s6 = scalar_lea.vmem %s4408_s21, 128 }
 0x291   :  { %p5678_p6 = scmp.ne.s32.totalorder %s4408_s21, %s5677_s6  ;;  %p5683_p8 = scmp.lt.s32.totalorder %s5677_s6, %s5677_s6 }
 0x293   :  { %4980 = vmatpush3.bf16.msra.mxu0 %v5511_v45  ;;  %5002 = vmatpush3.bf16.msra.mxu1 %v5512_v46  ;;  %p5684_p9 = por %p5683_p8, %p5682_p7 }
 0x294   :  { %4981 = vmatprep.subr.bf16.mxu0 %v5513_v47  ;;  %5003 = vmatprep.subr.bf16.mxu1 %v5514_v48 }
 0x295   :  { %p5685_p10 = pnand %p5684_p9, %p5678_p6 }
 0x297   :  { %4982 = vmatpush3.bf16.msra.mxu0 %v5515_v12  ;;  %5004 = vmatpush3.bf16.msra.mxu1 %v5516_v49 }
 0x298   :  { %4983 = vmatprep.subr.bf16.mxu0 %v5517_v50  ;;  %5005 = vmatprep.subr.bf16.mxu1 %v5518_v51 }
 0x29b   :  { %4984 = vmatpush3.bf16.msra.mxu0 %v5519_v57  ;;  %5006 = vmatpush3.bf16.msra.mxu1 %v5520_v52 }
 0x29c   :  { %4985 = vmatprep.subr.bf16.mxu0 %v5521_v54  ;;  %5007 = vmatprep.subr.bf16.mxu1 %v5522_v55  ;;  %v4968_v55 = vld [vmem:[%s5953_s8] ss:$0 sm:$0xff] }
 0x29f   :  { %4986 = vmatpush3.bf16.msra.mxu0 %v5523_v56  ;;  %5008 = vmatpush3.bf16.msra.mxu1 %v5524_v53 }
 0x2a0   :  { %4987 = vmatprep.subr.bf16.mxu0 %v5525_v58  ;;  %5009 = vmatprep.subr.bf16.mxu1 %v5526_v59 }
 0x2a3   :  { %4988 = vmatpush3.bf16.msra.mxu0 %v5527_v60  ;;  %5010 = vmatpush3.bf16.msra.mxu1 %v5528_v35 }
 0x2a4   :  { %4989 = vmatprep.subr.bf16.mxu0 %v5529_v61  ;;  %5011 = vmatprep.subr.bf16.mxu1 %v5530_v62 }
 0x2a7   :  { %4990 = vmatpush3.bf16.msra.mxu0 %v5531_v63  ;;  %5012 = vmatpush3.bf16.msra.mxu1 %v5532_v0 }
 0x2a8   :  { %4991 = vmatprep.subr.bf16.mxu0 %v5533_v1  ;;  %5013 = vmatprep.subr.bf16.mxu1 %v5534_v2 }
 0x2ab   :  { %4992 = vmatpush3.bf16.msra.mxu0 %v5535_v3  ;;  %5014 = vmatpush3.bf16.msra.mxu1 %v5536_v5 }
 0x2ac   :  { %5030 = vmatprep.subr.bf16.mxu0 %v5721_v6 }
 0x361   :  { %v3765_v13 = vpop.f32.mrb[8].mxu0  ;;  %v3929_v14 = vpop.f32.mrb[8].mxu1 }
 0x362   :  { %v5058_v16 = vadd.f32 %v3765_v13, %v2311_v8  ;;  %v5060_v17 = vadd.f32 %v3929_v14, %v2319_v9  ;;  %v3767_v18 = vpop.f32.mrb[9].mxu0  ;;  %v3931_v19 = vpop.f32.mrb[9].mxu1 }
 0x363   :  { %v5059_v20 = vadd.f32 %v3767_v18, %v2315_v10  ;;  %v5061_v21 = vadd.f32 %v3931_v19, %v2323_v11  ;;  %v3769_v22 = vpop.f32.mrb[10].mxu0  ;;  %v3933_v23 = vpop.f32.mrb[10].mxu1 }
 0x364   :  { %v3936_v27 = vmax.f32 %v5058_v16, 0.0  ;;  %v3938_v25 = vmax.f32 %v5060_v17, 0.0  ;;  %v3770_v31 = vpop.f32.mrb[11].mxu0  ;;  %v3934_v41 = vpop.f32.mrb[11].mxu1 }
 0x365   :  { %v3937_v32 = vmax.f32 %v5059_v20, 0.0  ;;  %v3939_v33 = vmax.f32 %v5061_v21, 0.0 }
 0x366   :  { %v3940_v30 = vpack.c.bf16 %v3936_v27, %v3936_v27  ;;  %v3942_v34 = vpack.c.bf16 %v3938_v25, %v3938_v25 }
 0x367   :  { %v3941_v29 = vpack.c.bf16 %v3937_v32, %v3937_v32  ;;  %v3943_v15 = vpack.c.bf16 %v3939_v33, %v3939_v33 }
 0x369   :  { %4239 = vmatprep.mubr.bf16.mxu0 %v3941_v29  ;;  %4279 = vmatprep.mubr.bf16.mxu1 %v3943_v15 }
 0x36a   :  { %4240 = vmatmul.mubr.bf16.vlgmr.msra.gmra.mrb[12].mxu0 %v3940_v30  ;;  %4280 = vmatmul.mubr.bf16.vlgmr.msra.gmra.mrb[12].mxu1 %v3942_v34 }
 0x36b   :  { %5031 = vmatpush3.bf16.msra.mxu0 %v5537_v26  ;;  %5046 = vmatprep.mubr.msk.bf16.mxu0 %vm5722_vm0, %v5721_v6 }
 0x36c   :  { %5032 = vmatprep.subr.bf16.mxu0 %v5721_v6 }
 0x36f   :  { %5033 = vmatpush3.bf16.msra.mxu0 %v5538_v36 }
 0x370   :  { %5034 = vmatprep.subr.bf16.mxu0 %v5721_v6 }
 0x373   :  { %5035 = vmatpush3.bf16.msra.mxu0 %v5539_v24 }
 0x374   :  { %5036 = vmatprep.subr.bf16.mxu0 %v5721_v6 }
 0x377   :  { %5037 = vmatpush3.bf16.msra.mxu0 %v5540_v37 }
 0x378   :  { %5038 = vmatprep.subr.bf16.mxu0 %v5721_v6 }
 0x37b   :  { %5039 = vmatpush3.bf16.msra.mxu0 %v5541_v38 }
 0x37c   :  { %5040 = vmatprep.subr.bf16.mxu0 %v5721_v6 }
 0x37f   :  { %5041 = vmatpush3.bf16.msra.mxu0 %v5542_v28 }
 0x380   :  { %5042 = vmatprep.subr.bf16.mxu0 %v5721_v6 }
 0x383   :  { %5043 = vmatpush3.bf16.msra.mxu0 %v5543_v39 }
 0x384   :  { %5044 = vmatprep.subr.bf16.mxu0 %v5721_v6 }
 0x387   :  { %5045 = vmatpush3.bf16.msra.mxu0 %v5544_v40 }
 0x43d   :  { %v4993_v42 = vpop.f32.mrb[12].mxu0  ;;  %v5015_v43 = vpop.f32.mrb[12].mxu1 }
 0x43e   :  { %v4994_v44 = vpop.f32.mrb[13].mxu0  ;;  %v5016_v45 = vpop.f32.mrb[13].mxu1 }
 0x43f   :  { %v4995_v46 = vadd.f32 %v4994_v44, %v4993_v42  ;;  %v5017_v47 = vadd.f32 %v5016_v45, %v5015_v43  ;;  %v4996_v48 = vpop.f32.mrb[14].mxu0  ;;  %v5018_v12 = vpop.f32.mrb[14].mxu1 }
 0x440   :  { %v4997_v49 = vpop.f32.mrb[15].mxu0  ;;  %v5019_v50 = vpop.f32.mrb[15].mxu1 }
 0x441   :  { %v4242_v51 = vadd.f32 %v4995_v46, %v4935_v4 }
 0x443   :  { %v4282_v57 = vadd.f32 %v5017_v47, %v4242_v51 }
 0x445   :  { %v4287_v52 = vmax.f32 %v4282_v57, 0.0 }
 0x447   :  { %v4288_v54 = vpack.c.bf16 %v4287_v52, %v4287_v52 }
 0x449   :  { %5047 = vmatmul.mubr.bf16.vlgmr.msra.gmra.mrb[16].mxu0 %v4288_v54 }
 0x51c   :  { %v4394_v56 = vpop.f32.mrb[16].mxu0 }
 0x51d   :  { %v4395_v53 = vadd.f32 %v4968_v55, %v4394_v56  ;;  %v5048_v58 = vpop.f32.mrb[17].mxu0 }
 0x51e   :  { %v4397_v59 = vpop.f32.mrb[18].mxu0 }
 0x51f   :  { %4400 = vst [vmem:[#allocation13] sm:$0xff] %v4395_v53  ;;  %v5049_v60 = vpop.f32.mrb[19].mxu0 }
 0x520   :  { %5688 = shalt.err (!%p5685_p10)
}
 0x521   :  { %s5689_s8 = scalar_lea.hbm %s5954_s9, 128 }
 0x522   :  { %p5690_p11 = scmp.ne.s32.totalorder %s5954_s9, %s5689_s8  ;;  %p5693_p12 = scmp.lt.u32.totalorder %s5689_s8, %s5954_s9 }
 0x524   :  { %p5695_p13 = pnand %p5693_p12, %p5690_p11 }
 0x526   :  { %5698 = shalt.err (!%p5695_p13)
}
 0x527   :  { %4410 = dma.vmem_to_hbm [thread:$0]  %s4408_s21, 128, %s5954_s9, [#allocation4]  }
 0x528   :  { %5707 = dma.done.wait [#allocation4], 128  }
 0x529   :  { %5708 = vsyncadd [#allocation4], 4294967168 }
 0x52a   :  { %4414 = vsyncpa [#allocation3], 1 }
 0x52b   :  { %4415 = vsyncpa [#allocation6], 1 }
 0x52c   :  { %4416 = vsyncpa [#allocation9], 1 }
 0x52d   :  { %4417 = vsyncpa [#allocation12], 1 }
 0x52e   :  { %4418 = vsyncpa [#allocation4], 1 }

</bundles_post_ra>
